<compile_context>
chip_gen: v7x
topology: tpu7x:2x2x1
jax: 0.10.0
libtpu: 0.0.40
codegen_flags: <defaults>
</compile_context>

<pallas_src>
import functools

import numpy as np
import jax
import jax.numpy as jnp
from jax.experimental import pallas as pl
from jax.experimental.pallas import tpu as pltpu


# ----------------------------------------------------------------------------
# Fused Pallas kernel
# ----------------------------------------------------------------------------
def _fused_window_attn_kernel(x_ref, wqkv_ref, wout_ref, bout_ref, bias_ref,
                              o_ref, win_ref, *, heads, head_dim, window_size,
                              nw_w, mxu_dtype):
    """One grid step = one batch element x one row of windows, all heads fused.

    x_ref    : (1, ws*n_w, dim)  row-slab of tokens, row-major over (w_h, col)
    wqkv_ref : (dim, 3*C)        resident; softmax scale folded into q columns
    wout_ref : (C, dim)          resident
    bout_ref : (1, dim)          resident, f32
    bias_ref : (nw_w, N, N)      pos-embedding + shift masks (additive), f32
    o_ref    : (1, ws*n_w, dim)  final (post out-projection) tokens
    win_ref  : (nw_w, N, 3*C)    f32 VMEM scratch holding window-ordered qkv
    """
    ws = window_size
    N = ws * ws
    D = head_dim
    C = heads * D
    n_w = nw_w * ws
    f32 = jnp.float32

    # ---- fused qkv projection: one MXU matmul, weights resident in VMEM ----
    qkv = jnp.dot(x_ref[0], wqkv_ref[...],
                  preferred_element_type=f32)                    # (ws*n_w, 3C) f32

    # ---- window rearrangement in VMEM (replaces the XLA reshape/transpose):
    #      token row (w_h, col = w*ws + w_w) -> win[w, w_h*ws + w_w, :]
    for w in range(nw_w):
        for wh in range(ws):
            src = wh * n_w + w * ws
            win_ref[w, wh * ws:wh * ws + ws, :] = qkv[src:src + ws, :]
    win = win_ref[...]                                           # (nw_w, N, 3C) f32

    # ---- split q/k/v + heads once; batch (head, window) on the leading axis
    #      so QK^T and PV are each ONE batched MXU einsum (no per-head matmuls).
    def heads_batch(base):
        parts = [win[:, :, base + h * D:base + (h + 1) * D] for h in range(heads)]
        return jnp.concatenate(parts, axis=0).astype(mxu_dtype)  # (heads*nw_w, N, D)

    q = heads_batch(0)
    k = heads_batch(C)
    v = heads_batch(2 * C)

    bias = jnp.broadcast_to(bias_ref[...][None], (heads, nw_w, N, N))
    bias = bias.reshape(heads * nw_w, N, N)                      # f32, has -inf masks

    # scale already folded into the q columns of w_qkv -> no `* scale` here
    dots = jnp.einsum('bid,bjd->bij', q, k,
                      preferred_element_type=f32) + bias         # f32 scores
    m = jnp.max(dots, axis=-1, keepdims=True)
    p = jnp.exp(dots - m)
    s = jnp.sum(p, axis=-1, keepdims=True)
    r = pl.reciprocal(s, approx=True)                            # EUP slot (cheap)
    r = r * (2.0 - s * r)                                        # one Newton refinement
    attn = (p * r).astype(mxu_dtype)
    pv = jnp.einsum('bij,bjd->bid', attn, v,
                    preferred_element_type=f32)                  # (heads*nw_w, N, D)

    # ---- merge heads back into channels (single lane-axis concat) ----
    ctx = jnp.concatenate([pv[h * nw_w:(h + 1) * nw_w] for h in range(heads)],
                          axis=-1)                               # (nw_w, N, C)

    # ---- fused output projection, still in window order ----
    ctx2d = ctx.reshape(nw_w * N, C).astype(mxu_dtype)
    proj = jnp.dot(ctx2d, wout_ref[...], preferred_element_type=f32)
    proj = (proj + bout_ref[...]).astype(o_ref.dtype)            # (nw_w*N, dim)

    # ---- undo the window rearrangement while storing the output ----
    # TODO(synk): for dim < 128 these stores are lane-masked; a fully lane-dense
    # (ws, n_w*dim) store would need an in-kernel sublane->lane relayout.
    for w in range(nw_w):
        for wh in range(ws):
            dst = wh * n_w + w * ws
            o_ref[0, dst:dst + ws, :] = proj[w * N + wh * ws:
                                             w * N + wh * ws + ws, :]


def pallas_swin_window_attention(x, w_qkv, w_out, b_out, bias, *, heads,
                                 head_dim, window_size, out_dtype=None,
                                 vmem_limit_bytes=64 * 1024 * 1024):
    """Fully fused WindowAttention core: qkv proj + windowed MHA + out proj."""
    B, n_h, n_w, dim = x.shape
    ws = window_size
    N = ws * ws
    C = heads * head_dim
    nw_h, nw_w = n_h // ws, n_w // ws
    NW = nw_h * nw_w
    assert n_h % ws == 0 and n_w % ws == 0
    assert w_qkv.shape == (dim, 3 * C)
    assert w_out.shape == (C, dim)
    assert bias.shape == (NW, N, N)
    if out_dtype is None:
        out_dtype = x.dtype

    # Flatten the spatial axes (free, row-major) so every block is a clean
    # (tokens, channels) slab: one grid step = one row of windows of one image.
    x_flat = x.reshape(B, n_h * n_w, dim)
    b_out2 = b_out.reshape(1, dim).astype(jnp.float32)
    bias = bias.astype(jnp.float32)

    kernel = functools.partial(
        _fused_window_attn_kernel, heads=heads, head_dim=head_dim,
        window_size=ws, nw_w=nw_w, mxu_dtype=x.dtype)

    tokens = B * n_h * n_w
    attn_flops = 4 * B * NW * heads * N * N * head_dim           # QK^T + PV
    cost = pl.CostEstimate(
        flops=2 * tokens * dim * 3 * C + attn_flops + 2 * tokens * C * dim,
        transcendentals=B * NW * heads * N * N,
        bytes_accessed=(int(x_flat.size) * x_flat.dtype.itemsize
                        + tokens * dim * np.dtype(out_dtype).itemsize
                        + int(w_qkv.size) * w_qkv.dtype.itemsize
                        + int(w_out.size) * w_out.dtype.itemsize
                        + int(b_out2.size) * 4 + int(bias.size) * 4))

    out = pl.pallas_call(
        kernel,
        out_shape=jax.ShapeDtypeStruct((B, n_h * n_w, dim), out_dtype),
        # B is the innermost grid axis: the weight / bias block indices do not
        # depend on it, so those blocks are fetched once and stay resident.
        grid=(nw_h, B),
        in_specs=[
            pl.BlockSpec((1, ws * n_w, dim), lambda r, b: (b, r, 0)),   # x row slab
            pl.BlockSpec((dim, 3 * C), lambda r, b: (0, 0)),            # w_qkv resident
            pl.BlockSpec((C, dim), lambda r, b: (0, 0)),                # w_out resident
            pl.BlockSpec((1, dim), lambda r, b: (0, 0)),                # b_out resident
            pl.BlockSpec((nw_w, N, N), lambda r, b: (r, 0, 0)),         # bias (b-invariant)
        ],
        out_specs=pl.BlockSpec((1, ws * n_w, dim), lambda r, b: (b, r, 0)),
        scratch_shapes=[pltpu.VMEM((nw_w, N, 3 * C), jnp.float32)],
        compiler_params=pltpu.CompilerParams(
            dimension_semantics=("parallel", "parallel"),
            vmem_limit_bytes=vmem_limit_bytes),
        cost_estimate=cost,
    )(x_flat, w_qkv, w_out, b_out2, bias)

    return out.reshape(B, n_h, n_w, dim)


# ----------------------------------------------------------------------------
# Parameter / mask construction (plain numpy / JAX glue)
# ----------------------------------------------------------------------------
def create_mask(window_size, displacement, upper_lower, left_right):
    mask = np.zeros((window_size ** 2, window_size ** 2), dtype=np.float32)
    if upper_lower:
        mask[-displacement * window_size:, :-displacement * window_size] = -np.inf
        mask[:-displacement * window_size, -displacement * window_size:] = -np.inf
    if left_right:
        mask = mask.reshape(window_size, window_size, window_size, window_size)
        mask[:, -displacement:, :, :-displacement] = -np.inf
        mask[:, :-displacement, :, -displacement:] = -np.inf
        mask = mask.reshape(window_size ** 2, window_size ** 2)
    return mask


def get_relative_distances(window_size):
    indices = np.array([[x, y] for x in range(window_size) for y in range(window_size)])
    distances = indices[None, :, :] - indices[:, None, :]
    return distances


def init_params(key, dim, heads, head_dim, window_size, relative_pos_embedding):
    inner_dim = heads * head_dim
    k1, k2, k3, k4 = jax.random.split(key, 4)
    bound_qkv = 1.0 / np.sqrt(dim)
    bound_out = 1.0 / np.sqrt(inner_dim)
    params = {
        "w_qkv": jax.random.uniform(k1, (dim, inner_dim * 3), jnp.float32,
                                    -bound_qkv, bound_qkv),
        "w_out": jax.random.uniform(k2, (inner_dim, dim), jnp.float32,
                                    -bound_out, bound_out),
        "b_out": jax.random.uniform(k3, (dim,), jnp.float32, -bound_out, bound_out),
    }
    if relative_pos_embedding:
        params["pos_embedding"] = jax.random.normal(
            k4, (2 * window_size - 1, 2 * window_size - 1), jnp.float32)
    else:
        params["pos_embedding"] = jax.random.normal(
            k4, (window_size ** 2, window_size ** 2), jnp.float32)
    return params


def build_pos_bias(params, window_size, relative_pos_embedding):
    N = window_size ** 2
    if relative_pos_embedding:
        rel = get_relative_distances(window_size) + window_size - 1  # (N, N, 2)
        pos = params["pos_embedding"][rel[:, :, 0], rel[:, :, 1]]     # (N, N)
    else:
        pos = params["pos_embedding"]
    return pos.astype(jnp.float32).reshape(N, N)


def build_window_bias(pos_bias, window_size, nw_h, nw_w, shifted):
    """Combine pos bias + (optional) shift masks into one (NW, N, N) table."""
    N = window_size ** 2
    NW = nw_h * nw_w
    bias = np.broadcast_to(np.asarray(pos_bias), (NW, N, N)).copy()
    if shifted:
        displacement = window_size // 2
        ul = create_mask(window_size, displacement, upper_lower=True, left_right=False)
        lr = create_mask(window_size, displacement, upper_lower=False, left_right=True)
        # dots[:, :, -nw_w:] += upper_lower_mask  -> last row of windows
        bias[NW - nw_w:] += ul
        # dots[:, :, nw_w-1::nw_w] += left_right_mask -> last column of windows
        bias[nw_w - 1::nw_w] += lr
    return jnp.asarray(bias, dtype=jnp.float32)


# ----------------------------------------------------------------------------
# WindowAttention forward (Pallas-backed)
# ----------------------------------------------------------------------------
def window_attention_forward(x, params, *, heads, head_dim, window_size,
                             shifted, relative_pos_embedding,
                             mxu_dtype=jnp.float32):
    b, n_h, n_w, dim = x.shape
    ws = window_size
    C = heads * head_dim
    scale = head_dim ** (-0.5)
    nw_h, nw_w = n_h // ws, n_w // ws
    out_dtype = x.dtype

    # Fold the softmax scale into the q columns of the qkv weight (free at run
    # time; removes the per-element `dots * scale` from the kernel).
    col_scale = jnp.concatenate(
        [jnp.full((C,), scale, jnp.float32), jnp.ones((2 * C,), jnp.float32)])
    w_qkv = (params["w_qkv"].astype(jnp.float32) * col_scale[None, :]).astype(mxu_dtype)
    w_out = params["w_out"].astype(mxu_dtype)

    # Per-window additive bias (relative pos embedding + shift masks), built
    # once into a single (NW, N, N) f32 table.
    pos_bias = build_pos_bias(params, ws, relative_pos_embedding)
    bias = build_window_bias(pos_bias, ws, nw_h, nw_w, shifted)

    # TODO(synk): the cyclic (wrap-around) shift is not expressible with a
    # blocked index_map, so it stays as an XLA jnp.roll around the fused kernel.
    if shifted:
        disp = ws // 2
        x = jnp.roll(x, shift=(-disp, -disp), axis=(1, 2))

    out = pallas_swin_window_attention(
        x.astype(mxu_dtype), w_qkv, w_out, params["b_out"], bias,
        heads=heads, head_dim=head_dim, window_size=ws, out_dtype=out_dtype)

    if shifted:
        out = jnp.roll(out, shift=(disp, disp), axis=(1, 2))
    return out


# ----------------------------------------------------------------------------
# Pure-JAX reference (mirrors the PyTorch forward) for verification
# ----------------------------------------------------------------------------
def window_attention_reference(x, params, *, heads, head_dim, window_size,
                               shifted, relative_pos_embedding):
    b, n_h, n_w, dim = x.shape
    ws = window_size
    N = ws * ws
    scale = head_dim ** (-0.5)
    nw_h, nw_w = n_h // ws, n_w // ws
    NW = nw_h * nw_w

    if shifted:
        disp = ws // 2
        x = jnp.roll(x, shift=(-disp, -disp), axis=(1, 2))

    qkv = x @ params["w_qkv"]
    q, k, v = jnp.split(qkv, 3, axis=-1)

    def to_windows(t):
        t = t.reshape(b, nw_h, ws, nw_w, ws, heads, head_dim)
        t = t.transpose(0, 5, 1, 3, 2, 4, 6)
        return t.reshape(b, heads, NW, N, head_dim)

    q, k, v = map(to_windows, (q, k, v))
    dots = jnp.einsum('bhwid,bhwjd->bhwij', q, k) * scale
    dots = dots + build_pos_bias(params, ws, relative_pos_embedding)
    if shifted:
        disp = ws // 2
        ul = jnp.asarray(create_mask(ws, disp, True, False))
        lr = jnp.asarray(create_mask(ws, disp, False, True))
        dots = dots.at[:, :, -nw_w:].add(ul)
        dots = dots.at[:, :, nw_w - 1::nw_w].add(lr)
    attn = jax.nn.softmax(dots, axis=-1)
    out = jnp.einsum('bhwij,bhwjd->bhwid', attn, v)
    out = out.reshape(b, heads, nw_h, nw_w, ws, ws, head_dim)
    out = out.transpose(0, 2, 4, 3, 5, 1, 6).reshape(b, n_h, n_w, heads * head_dim)
    out = out @ params["w_out"] + params["b_out"]
    if shifted:
        disp = ws // 2
        out = jnp.roll(out, shift=(disp, disp), axis=(1, 2))
    return out


# ----------------------------------------------------------------------------
if __name__ == "__main__":
    # Small config consistent with the module: dim=32, heads=4, head_dim=8,
    # window_size=4, relative_pos_embedding=True, spatial 8x8, batch 2.
    dim, heads, head_dim = 32, 4, 8
    window_size = 4
    relative_pos_embedding = True
    b, n_h, n_w = 2, 8, 8

    key = jax.random.PRNGKey(0)
    kp, kx = jax.random.split(key)
    params = init_params(kp, dim, heads, head_dim, window_size,
                         relative_pos_embedding)
    x = jax.random.normal(kx, (b, n_h, n_w, dim), jnp.float32)

    # f32 MXU path: shifted and non-shifted windows.
    for shifted in (True, False):
        cfg = dict(heads=heads, head_dim=head_dim, window_size=window_size,
                   shifted=shifted, relative_pos_embedding=relative_pos_embedding)
        out = jax.block_until_ready(window_attention_forward(x, params, **cfg))
        ref = jax.block_until_ready(window_attention_reference(x, params, **cfg))
        np.testing.assert_allclose(np.asarray(out), np.asarray(ref),
                                   rtol=1e-3, atol=1e-3)

    # bf16 MXU-operand path (f32 accumulation, f32 softmax/bias): looser tol.
    cfg = dict(heads=heads, head_dim=head_dim, window_size=window_size,
               shifted=True, relative_pos_embedding=relative_pos_embedding)
    out_bf16 = jax.block_until_ready(
        window_attention_forward(x, params, mxu_dtype=jnp.bfloat16, **cfg))
    ref = jax.block_until_ready(window_attention_reference(x, params, **cfg))
    np.testing.assert_allclose(np.asarray(out_bf16), np.asarray(ref),
                               rtol=5e-2, atol=5e-2)

    print("KERNEL_OK")
</pallas_src>

<mosaic_0001>
module attributes {stable_mosaic.version = 11 : i64} {
  func.func @_fused_window_attn_kernel(%arg0: i32, %arg1: i32, %arg2: memref<1x32x32xf32, #tpu.memory_space<vmem>>, %arg3: memref<32x96xf32, #tpu.memory_space<vmem>>, %arg4: memref<32x32xf32, #tpu.memory_space<vmem>>, %arg5: memref<1x32xf32, #tpu.memory_space<vmem>>, %arg6: memref<2x16x16xf32, #tpu.memory_space<vmem>>, %arg7: memref<1x32x32xf32, #tpu.memory_space<vmem>>, %arg8: memref<2x16x96xf32, #tpu.memory_space<vmem>>) attributes {dimension_semantics = [#tpu.dimension_semantics<parallel>, #tpu.dimension_semantics<parallel>], iteration_bounds = array<i64: 2, 2>, scalar_prefetch = 0 : i64, scratch_operands = 1 : i64, tpu.core_type = #tpu.core_type<tc>, window_params = [{transform_indices = @transform_0, window_bounds = array<i64: 1, 32, 32>}, {pipeline_mode = #tpu.pipeline_mode<synchronous>, transform_indices = @transform_1, window_bounds = array<i64: 32, 96>}, {pipeline_mode = #tpu.pipeline_mode<synchronous>, transform_indices = @transform_2, window_bounds = array<i64: 32, 32>}, {pipeline_mode = #tpu.pipeline_mode<synchronous>, transform_indices = @transform_3, window_bounds = array<i64: 1, 32>}, {transform_indices = @transform_4, window_bounds = array<i64: 2, 16, 16>}, {transform_indices = @transform_5, window_bounds = array<i64: 1, 32, 32>}]} {
    %c0 = arith.constant 0 : index
    %c0_0 = arith.constant 0 : index
    %c0_1 = arith.constant 0 : index
    %0 = vector.load %arg2[%c0, %c0_0, %c0_1] : memref<1x32x32xf32, #tpu.memory_space<vmem>>, vector<1x32x32xf32>
    %1 = vector.shape_cast %0 : vector<1x32x32xf32> to vector<32x32xf32>
    %c0_2 = arith.constant 0 : index
    %c0_3 = arith.constant 0 : index
    %2 = vector.load %arg3[%c0_2, %c0_3] : memref<32x96xf32, #tpu.memory_space<vmem>>, vector<32x96xf32>
    %cst = arith.constant dense<0.000000e+00> : vector<32x96xf32>
    %3 = tpu.matmul %1, %2, %cst {dimension_numbers = #tpu.dot_dimension_numbers<[1], [0], [0], [1], [0, 0, 1, 1], [], []>} : vector<32x32xf32>, vector<32x96xf32>, vector<32x96xf32> -> vector<32x96xf32>
    %4 = vector.extract_strided_slice %3 {offsets = [0, 0], sizes = [4, 96], strides = [1, 1]} : vector<32x96xf32> to vector<4x96xf32>
    %c0_4 = arith.constant 0 : index
    %c0_5 = arith.constant 0 : index
    %c0_6 = arith.constant 0 : index
    %5 = vector.load %arg8[%c0_4, %c0_5, %c0_6] : memref<2x16x96xf32, #tpu.memory_space<vmem>>, vector<1x4x96xf32>
    %6 = vector.shape_cast %5 : vector<1x4x96xf32> to vector<4x96xf32>
    %7 = vector.shape_cast %4 : vector<4x96xf32> to vector<1x4x96xf32>
    tpu.vector_store %arg8[%c0_4, %c0_5, %c0_6], %7 {strides = array<i32>} : memref<2x16x96xf32, #tpu.memory_space<vmem>>, vector<1x4x96xf32>,
    %8 = vector.extract_strided_slice %3 {offsets = [8, 0], sizes = [4, 96], strides = [1, 1]} : vector<32x96xf32> to vector<4x96xf32>
    %c0_7 = arith.constant 0 : index
    %c4 = arith.constant 4 : index
    %c0_8 = arith.constant 0 : index
    %9 = vector.load %arg8[%c0_7, %c4, %c0_8] : memref<2x16x96xf32, #tpu.memory_space<vmem>>, vector<1x4x96xf32>
    %10 = vector.shape_cast %9 : vector<1x4x96xf32> to vector<4x96xf32>
    %11 = vector.shape_cast %8 : vector<4x96xf32> to vector<1x4x96xf32>
    tpu.vector_store %arg8[%c0_7, %c4, %c0_8], %11 {strides = array<i32>} : memref<2x16x96xf32, #tpu.memory_space<vmem>>, vector<1x4x96xf32>,
    %12 = vector.extract_strided_slice %3 {offsets = [16, 0], sizes = [4, 96], strides = [1, 1]} : vector<32x96xf32> to vector<4x96xf32>
    %c0_9 = arith.constant 0 : index
    %c8 = arith.constant 8 : index
    %c0_10 = arith.constant 0 : index
    %13 = vector.load %arg8[%c0_9, %c8, %c0_10] : memref<2x16x96xf32, #tpu.memory_space<vmem>>, vector<1x4x96xf32>
    %14 = vector.shape_cast %13 : vector<1x4x96xf32> to vector<4x96xf32>
    %15 = vector.shape_cast %12 : vector<4x96xf32> to vector<1x4x96xf32>
    tpu.vector_store %arg8[%c0_9, %c8, %c0_10], %15 {strides = array<i32>} : memref<2x16x96xf32, #tpu.memory_space<vmem>>, vector<1x4x96xf32>,
    %16 = vector.extract_strided_slice %3 {offsets = [24, 0], sizes = [4, 96], strides = [1, 1]} : vector<32x96xf32> to vector<4x96xf32>
    %c0_11 = arith.constant 0 : index
    %c12 = arith.constant 12 : index
    %c0_12 = arith.constant 0 : index
    %17 = vector.load %arg8[%c0_11, %c12, %c0_12] : memref<2x16x96xf32, #tpu.memory_space<vmem>>, vector<1x4x96xf32>
    %18 = vector.shape_cast %17 : vector<1x4x96xf32> to vector<4x96xf32>
    %19 = vector.shape_cast %16 : vector<4x96xf32> to vector<1x4x96xf32>
    tpu.vector_store %arg8[%c0_11, %c12, %c0_12], %19 {strides = array<i32>} : memref<2x16x96xf32, #tpu.memory_space<vmem>>, vector<1x4x96xf32>,
    %20 = vector.extract_strided_slice %3 {offsets = [4, 0], sizes = [4, 96], strides = [1, 1]} : vector<32x96xf32> to vector<4x96xf32>
    %c1 = arith.constant 1 : index
    %c0_13 = arith.constant 0 : index
    %c0_14 = arith.constant 0 : index
    %21 = vector.load %arg8[%c1, %c0_13, %c0_14] : memref<2x16x96xf32, #tpu.memory_space<vmem>>, vector<1x4x96xf32>
    %22 = vector.shape_cast %21 : vector<1x4x96xf32> to vector<4x96xf32>
    %23 = vector.shape_cast %20 : vector<4x96xf32> to vector<1x4x96xf32>
    tpu.vector_store %arg8[%c1, %c0_13, %c0_14], %23 {strides = array<i32>} : memref<2x16x96xf32, #tpu.memory_space<vmem>>, vector<1x4x96xf32>,
    %24 = vector.extract_strided_slice %3 {offsets = [12, 0], sizes = [4, 96], strides = [1, 1]} : vector<32x96xf32> to vector<4x96xf32>
    %c1_15 = arith.constant 1 : index
    %c4_16 = arith.constant 4 : index
    %c0_17 = arith.constant 0 : index
    %25 = vector.load %arg8[%c1_15, %c4_16, %c0_17] : memref<2x16x96xf32, #tpu.memory_space<vmem>>, vector<1x4x96xf32>
    %26 = vector.shape_cast %25 : vector<1x4x96xf32> to vector<4x96xf32>
    %27 = vector.shape_cast %24 : vector<4x96xf32> to vector<1x4x96xf32>
    tpu.vector_store %arg8[%c1_15, %c4_16, %c0_17], %27 {strides = array<i32>} : memref<2x16x96xf32, #tpu.memory_space<vmem>>, vector<1x4x96xf32>,
    %28 = vector.extract_strided_slice %3 {offsets = [20, 0], sizes = [4, 96], strides = [1, 1]} : vector<32x96xf32> to vector<4x96xf32>
    %c1_18 = arith.constant 1 : index
    %c8_19 = arith.constant 8 : index
    %c0_20 = arith.constant 0 : index
    %29 = vector.load %arg8[%c1_18, %c8_19, %c0_20] : memref<2x16x96xf32, #tpu.memory_space<vmem>>, vector<1x4x96xf32>
    %30 = vector.shape_cast %29 : vector<1x4x96xf32> to vector<4x96xf32>
    %31 = vector.shape_cast %28 : vector<4x96xf32> to vector<1x4x96xf32>
    tpu.vector_store %arg8[%c1_18, %c8_19, %c0_20], %31 {strides = array<i32>} : memref<2x16x96xf32, #tpu.memory_space<vmem>>, vector<1x4x96xf32>,
    %32 = vector.extract_strided_slice %3 {offsets = [28, 0], sizes = [4, 96], strides = [1, 1]} : vector<32x96xf32> to vector<4x96xf32>
    %c1_21 = arith.constant 1 : index
    %c12_22 = arith.constant 12 : index
    %c0_23 = arith.constant 0 : index
    %33 = vector.load %arg8[%c1_21, %c12_22, %c0_23] : memref<2x16x96xf32, #tpu.memory_space<vmem>>, vector<1x4x96xf32>
    %34 = vector.shape_cast %33 : vector<1x4x96xf32> to vector<4x96xf32>
    %35 = vector.shape_cast %32 : vector<4x96xf32> to vector<1x4x96xf32>
    tpu.vector_store %arg8[%c1_21, %c12_22, %c0_23], %35 {strides = array<i32>} : memref<2x16x96xf32, #tpu.memory_space<vmem>>, vector<1x4x96xf32>,
    %c0_24 = arith.constant 0 : index
    %c0_25 = arith.constant 0 : index
    %c0_26 = arith.constant 0 : index
    %36 = vector.load %arg8[%c0_24, %c0_25, %c0_26] : memref<2x16x96xf32, #tpu.memory_space<vmem>>, vector<2x16x96xf32>
    %37 = vector.extract_strided_slice %36 {offsets = [0, 0, 0], sizes = [2, 16, 8], strides = [1, 1, 1]} : vector<2x16x96xf32> to vector<2x16x8xf32>
    %38 = vector.extract_strided_slice %36 {offsets = [0, 0, 8], sizes = [2, 16, 8], strides = [1, 1, 1]} : vector<2x16x96xf32> to vector<2x16x8xf32>
    %39 = vector.extract_strided_slice %36 {offsets = [0, 0, 16], sizes = [2, 16, 8], strides = [1, 1, 1]} : vector<2x16x96xf32> to vector<2x16x8xf32>
    %40 = vector.extract_strided_slice %36 {offsets = [0, 0, 24], sizes = [2, 16, 8], strides = [1, 1, 1]} : vector<2x16x96xf32> to vector<2x16x8xf32>
    %41 = tpu.concatenate %37, %38, %39, %40 in 0 : vector<2x16x8xf32>, vector<2x16x8xf32>, vector<2x16x8xf32>, vector<2x16x8xf32> -> vector<8x16x8xf32>
    %42 = vector.extract_strided_slice %36 {offsets = [0, 0, 32], sizes = [2, 16, 8], strides = [1, 1, 1]} : vector<2x16x96xf32> to vector<2x16x8xf32>
    %43 = vector.extract_strided_slice %36 {offsets = [0, 0, 40], sizes = [2, 16, 8], strides = [1, 1, 1]} : vector<2x16x96xf32> to vector<2x16x8xf32>
    %44 = vector.extract_strided_slice %36 {offsets = [0, 0, 48], sizes = [2, 16, 8], strides = [1, 1, 1]} : vector<2x16x96xf32> to vector<2x16x8xf32>
    %45 = vector.extract_strided_slice %36 {offsets = [0, 0, 56], sizes = [2, 16, 8], strides = [1, 1, 1]} : vector<2x16x96xf32> to vector<2x16x8xf32>
    %46 = tpu.concatenate %42, %43, %44, %45 in 0 : vector<2x16x8xf32>, vector<2x16x8xf32>, vector<2x16x8xf32>, vector<2x16x8xf32> -> vector<8x16x8xf32>
    %47 = vector.extract_strided_slice %36 {offsets = [0, 0, 64], sizes = [2, 16, 8], strides = [1, 1, 1]} : vector<2x16x96xf32> to vector<2x16x8xf32>
    %48 = vector.extract_strided_slice %36 {offsets = [0, 0, 72], sizes = [2, 16, 8], strides = [1, 1, 1]} : vector<2x16x96xf32> to vector<2x16x8xf32>
    %49 = vector.extract_strided_slice %36 {offsets = [0, 0, 80], sizes = [2, 16, 8], strides = [1, 1, 1]} : vector<2x16x96xf32> to vector<2x16x8xf32>
    %50 = vector.extract_strided_slice %36 {offsets = [0, 0, 88], sizes = [2, 16, 8], strides = [1, 1, 1]} : vector<2x16x96xf32> to vector<2x16x8xf32>
    %51 = tpu.concatenate %47, %48, %49, %50 in 0 : vector<2x16x8xf32>, vector<2x16x8xf32>, vector<2x16x8xf32>, vector<2x16x8xf32> -> vector<8x16x8xf32>
    %c0_27 = arith.constant 0 : index
    %c0_28 = arith.constant 0 : index
    %c0_29 = arith.constant 0 : index
    %52 = vector.load %arg6[%c0_27, %c0_28, %c0_29] : memref<2x16x16xf32, #tpu.memory_space<vmem>>, vector<2x16x16xf32>
    %53 = vector.shape_cast %52 : vector<2x16x16xf32> to vector<1x2x16x16xf32>
    %54 = vector.shape_cast %53 : vector<1x2x16x16xf32> to vector<1x2x16x16xf32>
    %55 = vector.broadcast %54 : vector<1x2x16x16xf32> to vector<4x2x16x16xf32>
    %56 = vector.shape_cast %55 : vector<4x2x16x16xf32> to vector<8x16x16xf32>
    "tpu.trace_start"() <{level = 10 : i32, message = "bid,bjd->bij"}> : () -> ()
    %cst_30 = arith.constant dense<0.000000e+00> : vector<8x16x16xf32>
    %57 = tpu.matmul %41, %46, %cst_30 {dimension_numbers = #tpu.dot_dimension_numbers<[2], [2], [1], [1], [0, 0, 0, 1, 1, 1], [0], [0]>} : vector<8x16x8xf32>, vector<8x16x8xf32>, vector<8x16x16xf32> -> vector<8x16x16xf32>
    "tpu.trace_stop"() : () -> ()
    %58 = arith.addf %57, %56 : vector<8x16x16xf32>
    %cst_31 = arith.constant dense<0xFF800000> : vector<8x16xf32>
    %59 = vector.multi_reduction <maximumf>, %58, %cst_31 [2] : vector<8x16x16xf32> to vector<8x16xf32>
    %60 = vector.shape_cast %59 : vector<8x16xf32> to vector<8x16x1xf32>
    %61 = vector.broadcast %60 : vector<8x16x1xf32> to vector<8x16x16xf32>
    %62 = arith.subf %58, %61 : vector<8x16x16xf32>
    %63 = math.exp %62 : vector<8x16x16xf32>
    %cst_32 = arith.constant dense<0.000000e+00> : vector<8x16xf32>
    %64 = vector.multi_reduction <add>, %63, %cst_32 [2] : vector<8x16x16xf32> to vector<8x16xf32>
    %65 = vector.shape_cast %64 : vector<8x16xf32> to vector<8x16x1xf32>
    %66 = tpu.reciprocal %65 {approx = true} : vector<8x16x1xf32> -> vector<8x16x1xf32>
    %67 = arith.mulf %65, %66 : vector<8x16x1xf32>
    %cst_33 = arith.constant 2.000000e+00 : f32
    %68 = vector.broadcast %cst_33 : f32 to vector<8x16x1xf32>
    %69 = arith.subf %68, %67 : vector<8x16x1xf32>
    %70 = arith.mulf %66, %69 : vector<8x16x1xf32>
    %71 = vector.broadcast %70 : vector<8x16x1xf32> to vector<8x16x16xf32>
    %72 = arith.mulf %63, %71 : vector<8x16x16xf32>
    "tpu.trace_start"() <{level = 10 : i32, message = "bij,bjd->bid"}> : () -> ()
    %cst_34 = arith.constant dense<0.000000e+00> : vector<8x16x8xf32>
    %73 = tpu.matmul %72, %51, %cst_34 {dimension_numbers = #tpu.dot_dimension_numbers<[2], [1], [1], [2], [0, 0, 0, 1, 1, 2], [0], [0]>} : vector<8x16x16xf32>, vector<8x16x8xf32>, vector<8x16x8xf32> -> vector<8x16x8xf32>
    "tpu.trace_stop"() : () -> ()
    %74 = vector.extract_strided_slice %73 {offsets = [0, 0, 0], sizes = [2, 16, 8], strides = [1, 1, 1]} : vector<8x16x8xf32> to vector<2x16x8xf32>
    %75 = vector.extract_strided_slice %73 {offsets = [2, 0, 0], sizes = [2, 16, 8], strides = [1, 1, 1]} : vector<8x16x8xf32> to vector<2x16x8xf32>
    %76 = vector.extract_strided_slice %73 {offsets = [4, 0, 0], sizes = [2, 16, 8], strides = [1, 1, 1]} : vector<8x16x8xf32> to vector<2x16x8xf32>
    %77 = vector.extract_strided_slice %73 {offsets = [6, 0, 0], sizes = [2, 16, 8], strides = [1, 1, 1]} : vector<8x16x8xf32> to vector<2x16x8xf32>
    %78 = tpu.concatenate %74, %75, %76, %77 in 2 : vector<2x16x8xf32>, vector<2x16x8xf32>, vector<2x16x8xf32>, vector<2x16x8xf32> -> vector<2x16x32xf32>
    %79 = vector.shape_cast %78 : vector<2x16x32xf32> to vector<32x32xf32>
    %c0_35 = arith.constant 0 : index
    %c0_36 = arith.constant 0 : index
    %80 = vector.load %arg4[%c0_35, %c0_36] : memref<32x32xf32, #tpu.memory_space<vmem>>, vector<32x32xf32>
    %cst_37 = arith.constant dense<0.000000e+00> : vector<32x32xf32>
    %81 = tpu.matmul %79, %80, %cst_37 {dimension_numbers = #tpu.dot_dimension_numbers<[1], [0], [0], [1], [0, 0, 1, 1], [], []>} : vector<32x32xf32>, vector<32x32xf32>, vector<32x32xf32> -> vector<32x32xf32>
    %c0_38 = arith.constant 0 : index
    %c0_39 = arith.constant 0 : index
    %82 = vector.load %arg5[%c0_38, %c0_39] : memref<1x32xf32, #tpu.memory_space<vmem>>, vector<1x32xf32>
    %83 = vector.broadcast %82 : vector<1x32xf32> to vector<32x32xf32>
    %84 = arith.addf %81, %83 : vector<32x32xf32>
    %85 = vector.extract_strided_slice %84 {offsets = [0, 0], sizes = [4, 32], strides = [1, 1]} : vector<32x32xf32> to vector<4x32xf32>
    %c0_40 = arith.constant 0 : index
    %c0_41 = arith.constant 0 : index
    %c0_42 = arith.constant 0 : index
    %86 = vector.load %arg7[%c0_40, %c0_41, %c0_42] : memref<1x32x32xf32, #tpu.memory_space<vmem>>, vector<1x4x32xf32>
    %87 = vector.shape_cast %86 : vector<1x4x32xf32> to vector<4x32xf32>
    %88 = vector.shape_cast %85 : vector<4x32xf32> to vector<1x4x32xf32>
    tpu.vector_store %arg7[%c0_40, %c0_41, %c0_42], %88 {strides = array<i32>} : memref<1x32x32xf32, #tpu.memory_space<vmem>>, vector<1x4x32xf32>,
    %89 = vector.extract_strided_slice %84 {offsets = [4, 0], sizes = [4, 32], strides = [1, 1]} : vector<32x32xf32> to vector<4x32xf32>
    %c0_43 = arith.constant 0 : index
    %c8_44 = arith.constant 8 : index
    %c0_45 = arith.constant 0 : index
    %90 = vector.load %arg7[%c0_43, %c8_44, %c0_45] : memref<1x32x32xf32, #tpu.memory_space<vmem>>, vector<1x4x32xf32>
    %91 = vector.shape_cast %90 : vector<1x4x32xf32> to vector<4x32xf32>
    %92 = vector.shape_cast %89 : vector<4x32xf32> to vector<1x4x32xf32>
    tpu.vector_store %arg7[%c0_43, %c8_44, %c0_45], %92 {strides = array<i32>} : memref<1x32x32xf32, #tpu.memory_space<vmem>>, vector<1x4x32xf32>,
    %93 = vector.extract_strided_slice %84 {offsets = [8, 0], sizes = [4, 32], strides = [1, 1]} : vector<32x32xf32> to vector<4x32xf32>
    %c0_46 = arith.constant 0 : index
    %c16 = arith.constant 16 : index
    %c0_47 = arith.constant 0 : index
    %94 = vector.load %arg7[%c0_46, %c16, %c0_47] : memref<1x32x32xf32, #tpu.memory_space<vmem>>, vector<1x4x32xf32>
    %95 = vector.shape_cast %94 : vector<1x4x32xf32> to vector<4x32xf32>
    %96 = vector.shape_cast %93 : vector<4x32xf32> to vector<1x4x32xf32>
    tpu.vector_store %arg7[%c0_46, %c16, %c0_47], %96 {strides = array<i32>} : memref<1x32x32xf32, #tpu.memory_space<vmem>>, vector<1x4x32xf32>,
    %97 = vector.extract_strided_slice %84 {offsets = [12, 0], sizes = [4, 32], strides = [1, 1]} : vector<32x32xf32> to vector<4x32xf32>
    %c0_48 = arith.constant 0 : index
    %c24 = arith.constant 24 : index
    %c0_49 = arith.constant 0 : index
    %98 = vector.load %arg7[%c0_48, %c24, %c0_49] : memref<1x32x32xf32, #tpu.memory_space<vmem>>, vector<1x4x32xf32>
    %99 = vector.shape_cast %98 : vector<1x4x32xf32> to vector<4x32xf32>
    %100 = vector.shape_cast %97 : vector<4x32xf32> to vector<1x4x32xf32>
    tpu.vector_store %arg7[%c0_48, %c24, %c0_49], %100 {strides = array<i32>} : memref<1x32x32xf32, #tpu.memory_space<vmem>>, vector<1x4x32xf32>,
    %101 = vector.extract_strided_slice %84 {offsets = [16, 0], sizes = [4, 32], strides = [1, 1]} : vector<32x32xf32> to vector<4x32xf32>
    %c0_50 = arith.constant 0 : index
    %c4_51 = arith.constant 4 : index
    %c0_52 = arith.constant 0 : index
    %102 = vector.load %arg7[%c0_50, %c4_51, %c0_52] : memref<1x32x32xf32, #tpu.memory_space<vmem>>, vector<1x4x32xf32>
    %103 = vector.shape_cast %102 : vector<1x4x32xf32> to vector<4x32xf32>
    %104 = vector.shape_cast %101 : vector<4x32xf32> to vector<1x4x32xf32>
    tpu.vector_store %arg7[%c0_50, %c4_51, %c0_52], %104 {strides = array<i32>} : memref<1x32x32xf32, #tpu.memory_space<vmem>>, vector<1x4x32xf32>,
    %105 = vector.extract_strided_slice %84 {offsets = [20, 0], sizes = [4, 32], strides = [1, 1]} : vector<32x32xf32> to vector<4x32xf32>
    %c0_53 = arith.constant 0 : index
    %c12_54 = arith.constant 12 : index
    %c0_55 = arith.constant 0 : index
    %106 = vector.load %arg7[%c0_53, %c12_54, %c0_55] : memref<1x32x32xf32, #tpu.memory_space<vmem>>, vector<1x4x32xf32>
    %107 = vector.shape_cast %106 : vector<1x4x32xf32> to vector<4x32xf32>
    %108 = vector.shape_cast %105 : vector<4x32xf32> to vector<1x4x32xf32>
    tpu.vector_store %arg7[%c0_53, %c12_54, %c0_55], %108 {strides = array<i32>} : memref<1x32x32xf32, #tpu.memory_space<vmem>>, vector<1x4x32xf32>,
    %109 = vector.extract_strided_slice %84 {offsets = [24, 0], sizes = [4, 32], strides = [1, 1]} : vector<32x32xf32> to vector<4x32xf32>
    %c0_56 = arith.constant 0 : index
    %c20 = arith.constant 20 : index
    %c0_57 = arith.constant 0 : index
    %110 = vector.load %arg7[%c0_56, %c20, %c0_57] : memref<1x32x32xf32, #tpu.memory_space<vmem>>, vector<1x4x32xf32>
    %111 = vector.shape_cast %110 : vector<1x4x32xf32> to vector<4x32xf32>
    %112 = vector.shape_cast %109 : vector<4x32xf32> to vector<1x4x32xf32>
    tpu.vector_store %arg7[%c0_56, %c20, %c0_57], %112 {strides = array<i32>} : memref<1x32x32xf32, #tpu.memory_space<vmem>>, vector<1x4x32xf32>,
    %113 = vector.extract_strided_slice %84 {offsets = [28, 0], sizes = [4, 32], strides = [1, 1]} : vector<32x32xf32> to vector<4x32xf32>
    %c0_58 = arith.constant 0 : index
    %c28 = arith.constant 28 : index
    %c0_59 = arith.constant 0 : index
    %114 = vector.load %arg7[%c0_58, %c28, %c0_59] : memref<1x32x32xf32, #tpu.memory_space<vmem>>, vector<1x4x32xf32>
    %115 = vector.shape_cast %114 : vector<1x4x32xf32> to vector<4x32xf32>
    %116 = vector.shape_cast %113 : vector<4x32xf32> to vector<1x4x32xf32>
    tpu.vector_store %arg7[%c0_58, %c28, %c0_59], %116 {strides = array<i32>} : memref<1x32x32xf32, #tpu.memory_space<vmem>>, vector<1x4x32xf32>,
    return
  }
  func.func @transform_0(%arg0: i32, %arg1: i32) -> (i32, i32, i32) {
    %c0_i32 = arith.constant 0 : i32
    %c0_i32_0 = arith.constant 0 : i32
    return %arg1, %arg0, %c0_i32 : i32, i32, i32
  }
  func.func @transform_1(%arg0: i32, %arg1: i32) -> (i32, i32) {
    %c0_i32 = arith.constant 0 : i32
    %c0_i32_0 = arith.constant 0 : i32
    %c0_i32_1 = arith.constant 0 : i32
    return %c0_i32, %c0_i32_0 : i32, i32
  }
  func.func @transform_2(%arg0: i32, %arg1: i32) -> (i32, i32) {
    %c0_i32 = arith.constant 0 : i32
    %c0_i32_0 = arith.constant 0 : i32
    %c0_i32_1 = arith.constant 0 : i32
    return %c0_i32, %c0_i32_0 : i32, i32
  }
  func.func @transform_3(%arg0: i32, %arg1: i32) -> (i32, i32) {
    %c0_i32 = arith.constant 0 : i32
    %c0_i32_0 = arith.constant 0 : i32
    %c0_i32_1 = arith.constant 0 : i32
    return %c0_i32, %c0_i32_0 : i32, i32
  }
  func.func @transform_4(%arg0: i32, %arg1: i32) -> (i32, i32, i32) {
    %c0_i32 = arith.constant 0 : i32
    %c0_i32_0 = arith.constant 0 : i32
    %c0_i32_1 = arith.constant 0 : i32
    return %arg0, %c0_i32, %c0_i32_0 : i32, i32, i32
  }
  func.func @transform_5(%arg0: i32, %arg1: i32) -> (i32, i32, i32) {
    %c0_i32 = arith.constant 0 : i32
    %c0_i32_0 = arith.constant 0 : i32
    return %arg1, %arg0, %c0_i32 : i32, i32, i32
  }
}

</mosaic_0001>

<bundles_post_ra>
// kernel: tpu_custom_call.1
= control target key start
LH: loop header
LB: loop body
LE: loop exit
PB: predicated region body
PF: predicated region fallthrough
CT: control target
= control target key end

     0   :  { %s4218_s0 = inlined_call_operand.hbm [shape: f32[2,64,32], index: 0, kind: input, shape index: {}]   ;;  %s4219_s1 = inlined_call_operand.hbm [shape: f32[32,96], index: 1, kind: input, shape index: {}]   ;;  %s4220_s2 = inlined_call_operand.hbm [shape: f32[32,32], index: 2, kind: input, shape index: {}]   ;;  %s4221_s3 = inlined_call_operand.hbm [shape: f32[1,32], index: 3, kind: input, shape index: {}]   ;;  %s4222_s4 = inlined_call_operand.hbm [shape: f32[4,16,16], index: 4, kind: input, shape index: {}]   ;;  %s4223_s5 = inlined_call_operand.hbm [shape: f32[2,64,32], index: 5, kind: output, shape index: {}]  }
   0x1   :  { %4250 = sst [smem:[#allocation28_spill]] %s4219_s1 }
   0x2   :  { %4251 = sst [smem:[#allocation29_spill]] %s4223_s5 }
   0x3   :  { %10 = vsyncpa [#allocation4], 0 }
   0x4   :  { %12 = vsyncpa [#allocation4 + $0x1], 0 }
   0x5   :  { %13 = vsyncpa [#allocation7], 0 }
   0x6   :  { %14 = vsyncpa [#allocation10], 0 }
   0x7   :  { %15 = vsyncpa [#allocation5], 0 }
   0x8   :  { %17 = vsyncpa [#allocation5 + $0x1], 0  ;;  %s3472_s18 = smov 0   ;;  %s3474_s19 = smov 0  }
   0x9   :  { %s3476_s20 = smov 0   ;;  %s3478_s21 = smov 0  }
   0xa   :  { %s3480_s22 = smov 0   ;;  %s3482_s23 = smov 0  }
   0xb   :  { %s3484_s24 = smov 0   ;;  %s3486_s25 = smov 0  }
   0xc   :  { %s3488_s26 = smov 0   ;;  %s3490_s27 = smov 0  }
   0xd   :  { %s3492_s28 = smov 0  }
   0xe LB: > { %4252 = sst [smem:[#allocation18_spill]] %s3395_s21  ;;  %s3526_s29 = sadd.s32 4294967295, %s3423_s28   ;;  %s3423_s28 = sphi %s3492_s28, %s23_s28   ;;  %s3419_s27 = sphi %s3490_s27, %s4311_s27   ;;  %s3415_s26 = sphi %s3488_s26, %s4310_s26   ;;  %s3411_s25 = sphi %s3486_s25, %s4309_s25   ;;  %s3407_s24 = sphi %s3484_s24, %s4308_s24   ;;  %s3403_s23 = sphi %s3482_s23, %s4307_s23   ;;  %s3399_s22 = sphi %s3480_s22, %s4306_s22   ;;  %s3395_s21 = sphi %s3478_s21, %s4300_s21   ;;  %s3391_s20 = sphi %s3476_s20, %s4305_s20   ;;  %s3387_s19 = sphi %s3474_s19, %s4304_s19   ;;  %s3383_s18 = sphi %s3472_s18, %s4303_s18  }
   0xf   : > { %4253 = sst [smem:[#allocation19_spill]] %s3399_s22  ;;  %s2450_s30 = sadd.s32 4294967294, %s3423_s28  }
  0x10   : > { %4254 = sst [smem:[#allocation20_spill]] %s3407_s24  ;;  %p57_p0 = scmp.ne.s32.totalorder %s3399_s22, %s3395_s21 }
  0x11   : > { %4255 = sst [smem:[#allocation21_spill]] %s3411_s25  ;;  %p4224_p1 = scmp.eq.s32.totalorder %s3526_s29, 0 }
  0x12   : > { %p146_p2 = scmp.ne.s32.totalorder %s3387_s19, %s3383_s18  ;;  %p178_p5 = scmp.eq.s32.totalorder %s2450_s30, 3 }
  0x13   : > { %p3536_p4 = por %p4224_p1, %p57_p0  ;;  %p2451_p7 = scmp.ge.s32.totalorder %s3423_s28, 1 }
  0x14   : > { %p3542_p6 = por %p146_p2, %p4224_p1  ;;  %p3547_p8 = por %p178_p5, %p57_p0 }
  0x15   : > { %s4256_s6 = scalar_select %p3536_p4, 1, 0 }
  0x16   : > { %s4258_s7 = scalar_select %p3542_p6, 1, 0 }
  0x17   : > { %4257 = sst [smem:[#allocation22_spill]] %s4256_s6  ;;  %p185_p9 = scmp.lt.s32.totalorder %s3423_s28, 5 }
  0x18   : > { %4259 = sst [smem:[#allocation23_spill]] %s4258_s7  ;;  %s3425_s10 = smov [#allocation6]  }
  0x19   : > { %s4260_s8 = scalar_select %p3547_p8, 1, 0 }
  0x1a   : > { %p3552_p10 = pnand %p2451_p7, %p185_p9  ;;  %s197_s11 = sshll.u32 %s3425_s10, 4  ;;  %s198_s11 = int_to_ptr.vmem [resolvable:$true] %s197_s11 }
  0x1b   : > { %4261 = sst [smem:[#allocation24_spill]] %s4260_s8  ;;  %s4264_s1 = sld [smem:[#allocation28_spill]] }
  0x1c   : > { %s4262_s9 = scalar_select %p3552_p10, 1, 0 }
  0x1d   : > { %p2870_p11 = pneg %p3552_p10 }
  0x1f   : > { %p3560_p12 = pnand %p2870_p11, %p4224_p1 }
  0x21   : > { %s4263_s12 = scalar_select %p3560_p12, 1, 0 }
  0x22   : > { %s3145_s15 = scalar_lea.hbm %s4264_s1, 512  ;;  %p3572_p0 = pneg %p3560_p12 }
  0x23   : > { %p3146_p13 = scmp.ne.s32.totalorder %s4264_s1, %s3145_s15  ;;  %p3152_p7 = scmp.lt.u32.totalorder %s3145_s15, %s4264_s1 }
  0x25   : > { %p3148_p2 = pnand %p3572_p0, %p3146_p13 }
  0x27   : > { %p3149_p5 = pneg %p3148_p2 }
  0x29   : > { %p3154_p9 = pnand %p3152_p7, %p3149_p5 }
  0x2b   : > { %3157 = shalt.err (!%p3154_p9)
}
  0x2c   : > { %s3158_s13 = scalar_lea.vmem %s198_s11, 512  ;;  %p3166_p8 = scmp.lt.s32.totalorder %s198_s11, %s198_s11 }
  0x2d   : > { %p3159_p11 = scmp.ne.s32.totalorder %s198_s11, %s3158_s13  ;;  %p3167_p6 = scmp.lt.s32.totalorder %s3158_s13, %s3158_s13 }
  0x2f   : > { %p3161_p1 = pnand %p3159_p11, %p3572_p0  ;;  %p3168_p4 = por %p3167_p6, %p3166_p8 }
  0x31   : > { %p3162_p3 = pneg %p3161_p1 }
  0x33   : > { %p3169_p10 = pnand %p3168_p4, %p3162_p3 }
  0x35   : > { %3172 = shalt.err (!%p3169_p10)
}
  0x36   : > { %s4229_s14 = smov 128   ;;  %s4231_s15 = smov 8  }
  0x37   : > { %2873 = dma.hbm_to_vmem [thread:$0]  (!%p3560_p12), %s4264_s1, 512, %s198_s11, [#allocation7], %s4229_s14, %s4229_s14, %s4231_s15  }
  0x38   : > { %s32_s30 = sadd.s32 1, %s3415_s26  ;;  %s35_s10 = sadd.s32 1, %s3419_s27 }
  0x39   : > { %p33_p1 = scmp.ge.s32.totalorder %s32_s30, 2  ;;  %s44_s13 = sadd.s32 1, %s3403_s23 }
  0x3a   : > { %p51_p3 = scmp.ne.s32.totalorder %s3403_s23, %s3399_s22  ;;  %p4246_p4 = scmp.eq.s32.totalorder %s3423_s28, 0 }
  0x3b   : > { %s4313_s30 = smov (%p33_p1, %s32_s30), 0  ;;  %s4315_s10 = smov (!%p33_p1, %s35_s10), %s3419_s27 }
  0x3c   : > { %4266 = sst [smem:[#allocation25_spill]] %s4313_s30  ;;  %s39_s8 = ssub.s32 %s3415_s26, %s4313_s30 }
  0x3d   : > { %p37_p6 = scmp.ge.s32.totalorder %s4315_s10, 2  ;;  %p4267_p8 = scmp.eq.s32.totalorder %s3526_s29, 3 }
  0x3e   : > { %p3610_p13 = por %p4246_p4, %p51_p3  ;;  %p4245_p2 = scmp.lt.s32.totalorder %s3423_s28, 4 }
  0x3f   : > { %p3604_p10 = por %p4267_p8, %p51_p3  ;;  %s4317_s10 = smov (%p37_p6, %s4315_s10), 0 }
  0x40   : > { %4271 = sst [smem:[#allocation27_spill]] %s4317_s10  ;;  %s235_s17 = sand.u32 1, %s3423_s28  }
  0x41   : > { %s4268_s11 = scalar_select %p3604_p10, 1, 0 }
  0x42   : > { %s237_s14 = sand.u32 1, %s3403_s23   ;;  %s3621_s15 = ssub.s32 %s3419_s27, %s4317_s10 }
  0x43   : > { %4269 = sst [smem:[#allocation26_spill]] %s4268_s11  ;;  %s41_s1 = sor.u32 %s3621_s15, %s39_s8 }
  0x44   : > { %p42_p7 = scmp.eq.s32.totalorder %s41_s1, 0  ;;  %s2456_s30 = sshll.u32 %s237_s14, 5 }
  0x45   : > { %s2457_s21 = sshll.u32 %s3419_s27, 2  ;;  %s2458_s11 = sshll.u32 %s3415_s26, 3 }
  0x46   : > { %s3627_s5 = scalar_select %p42_p7, %s3403_s23, %s44_s13  }
  0x47   : > { %s239_s24 = scalar_lea.vmem [#allocation3], %s2456_s30  ;;  %s245_s7 = sadd.s32 %s2458_s11, %s2457_s21 }
  0x48   : > { %s248_s25 = sshll.u32 %s239_s24, 4  ;;  %s2459_s6 = sshll.u32 %s245_s7, 7  ;;  %s3630_s25 = int_to_ptr.vmem [resolvable:$true] %s248_s25 }
  0x49   : > { %p3636_p9 = pnand %p4245_p2, %p3610_p13  ;;  %s3643_s1 = scalar_lea.hbm %s4218_s0, %s2459_s6 }
  0x4a   : > { %s3428_s21 = smov [#allocation8]   ;;  %s3647_s7 = scalar_lea.sflag [#allocation4], %s235_s17 }
  0x4b   : > { %s3645_s24 = sshll.u32 %s3428_s21, 4  ;;  %s3173_s14 = scalar_lea.hbm %s3643_s1, 512  ;;  %s211_s24 = int_to_ptr.vmem [resolvable:$true] %s3645_s24 }
  0x4c   : > { %p3174_p11 = scmp.ne.s32.totalorder %s3643_s1, %s3173_s14  ;;  %p3175_p1 = pneg %p3636_p9 }
  0x4d   : > { %s3178_s30 = scalar_lea.hbm %s4218_s0, 2048  ;;  %p3179_p8 = scmp.lt.u32.totalorder %s3643_s1, %s4218_s0 }
  0x4e   : > { %p3176_p3 = pnand %p3175_p1, %p3174_p11  ;;  %p3180_p13 = scmp.lt.u32.totalorder %s3178_s30, %s3173_s14 }
  0x4f   : > { %p3182_p2 = scmp.lt.u32.totalorder %s3173_s14, %s3643_s1 }
  0x50   : > { %p3177_p6 = pneg %p3176_p3  ;;  %p3181_p7 = por %p3180_p13, %p3179_p8 }
  0x52   : > { %p3183_p4 = por %p3182_p2, %p3181_p7 }
  0x54   : > { %p3184_p5 = pnand %p3183_p4, %p3177_p6 }
  0x56   : > { %3187 = shalt.err (!%p3184_p5)
}
  0x57   : > { %s3188_s16 = scalar_lea.vmem %s3630_s25, 512  ;;  %s3429_s17 = smov [#allocation3]  }
  0x58   : > { %p3189_p11 = scmp.ne.s32.totalorder %s3630_s25, %s3188_s16  ;;  %s3193_s8 = sshll.u32 %s3429_s17, 4  ;;  %s3194_s8 = int_to_ptr.vmem [resolvable:$false] %s3193_s8 }
  0x59   : > { %s3195_s21 = scalar_lea.vmem %s3194_s8, 1024  ;;  %p3196_p12 = scmp.lt.s32.totalorder %s3630_s25, %s3194_s8 }
  0x5a   : > { %p3191_p3 = pnand %p3189_p11, %p3175_p1  ;;  %p3197_p8 = scmp.lt.s32.totalorder %s3195_s21, %s3188_s16 }
  0x5c   : > { %p3192_p10 = pneg %p3191_p3  ;;  %p3198_p13 = por %p3197_p8, %p3196_p12 }
  0x5e   : > { %p3199_p2 = pnand %p3198_p13, %p3192_p10 }
  0x60   : > { %3202 = shalt.err (!%p3199_p2)
}
  0x61   : > { %s4273_s14 = smov 8   ;;  %s4274_s22 = smov 128  }
  0x62   : > { %2883 = dma.hbm_to_vmem [thread:$0]  (!%p3636_p9), %s3643_s1, 512, %s3630_s25, %s3647_s7, %s4274_s22, %s4274_s22, %s4273_s14  }
  0x63   : > { %s3203_s13 = scalar_lea.hbm %s4220_s2, 512 }
  0x64   : > { %p3204_p12 = scmp.ne.s32.totalorder %s4220_s2, %s3203_s13  ;;  %p3210_p5 = scmp.lt.u32.totalorder %s3203_s13, %s4220_s2 }
  0x66   : > { %p3206_p4 = pnand %p3204_p12, %p3572_p0 }
  0x68   : > { %p3207_p10 = pneg %p3206_p4 }
  0x6a   : > { %p3212_p1 = pnand %p3210_p5, %p3207_p10 }
  0x6c   : > { %3215 = shalt.err (!%p3212_p1)
}
  0x6d   : > { %s3216_s8 = scalar_lea.vmem %s211_s24, 512  ;;  %p3224_p11 = scmp.lt.s32.totalorder %s211_s24, %s211_s24 }
  0x6e   : > { %p3217_p9 = scmp.ne.s32.totalorder %s211_s24, %s3216_s8  ;;  %p3225_p3 = scmp.lt.s32.totalorder %s3216_s8, %s3216_s8 }
  0x70   : > { %p3219_p6 = pnand %p3217_p9, %p3572_p0  ;;  %p3226_p8 = por %p3225_p3, %p3224_p11 }
  0x72   : > { %p3220_p7 = pneg %p3219_p6 }
  0x74   : > { %p3227_p13 = pnand %p3226_p8, %p3220_p7 }
  0x76   : > { %3230 = shalt.err (!%p3227_p13)
}
  0x77   : > { %p4275_p2 = scmp.ne.s32.totalorder %s4263_s12, 0  ;;  %s3430_s21 = smov [#allocation9]  }
  0x78   : > { %s224_s6 = sshll.u32 %s3430_s21, 4  ;;  %s3231_s11 = scalar_lea.hbm %s4221_s3, 16  ;;  %s225_s6 = int_to_ptr.vmem [resolvable:$true] %s224_s6 }
  0x79   : > { %2876 = dma.hbm_to_vmem [thread:$0]  (!%p4275_p2), %s4220_s2, 512, %s211_s24, [#allocation7], %s4274_s22, %s4274_s22, %s4273_s14  }
  0x7a   : > { %p3232_p12 = scmp.ne.s32.totalorder %s4221_s3, %s3231_s11  ;;  %p3238_p5 = scmp.lt.u32.totalorder %s3231_s11, %s4221_s3 }
  0x7c   : > { %p3234_p4 = pnand %p3232_p12, %p3572_p0 }
  0x7e   : > { %p3235_p10 = pneg %p3234_p4 }
  0x80   : > { %p3240_p1 = pnand %p3238_p5, %p3235_p10 }
  0x82   : > { %3243 = shalt.err (!%p3240_p1)
}
  0x83   : > { %s3244_s24 = scalar_lea.vmem %s225_s6, 16  ;;  %s3251_s25 = scalar_lea.vmem %s225_s6, 32 }
  0x84   : > { %p3245_p9 = scmp.ne.s32.totalorder %s225_s6, %s3244_s24  ;;  %p3252_p11 = scmp.lt.s32.totalorder %s225_s6, %s225_s6 }
  0x85   : > { %p3253_p3 = scmp.lt.s32.totalorder %s3251_s25, %s3244_s24 }
  0x86   : > { %p3247_p6 = pnand %p3245_p9, %p3572_p0 }
  0x87   : > { %p3254_p8 = por %p3253_p3, %p3252_p11 }
  0x88   : > { %p3248_p7 = pneg %p3247_p6 }
  0x8a   : > { %p3255_p13 = pnand %p3254_p8, %p3248_p7 }
  0x8c   : > { %3258 = shalt.err (!%p3255_p13)
}
  0x8d   : > { %2879 = dma.hbm_to_vmem [thread:$0]  (!%p4275_p2), %s4221_s3, 16, %s225_s6, [#allocation10]  }
  0x8e   : > { %s133_s18 = sadd.s32 1, %s3391_s20  ;;  %p140_p0 = scmp.ne.s32.totalorder %s3391_s20, %s3387_s19 }
  0x8f   : > { %p4276_p12 = scmp.eq.s32.totalorder %s3621_s15, 0  ;;  %p4277_p4 = scmp.eq.s32.totalorder %s3423_s28, 0 }
  0x90   : > { %s260_s12 = sand.u32 1, %s3391_s20   ;;  %s2535_s11 = sshll.u32 %s3419_s27, 9 }
  0x91   : > { %s3724_s30 = scalar_select %p4276_p12, %s3391_s20, %s133_s18  }
  0x92   : > { %p142_p10 = por %p140_p0, %p4277_p4  ;;  %s2460_s13 = sshll.u32 %s260_s12, 5 }
  0x93   : > { %s3733_s17 = scalar_lea.hbm %s4222_s4, %s2535_s11  ;;  %s262_s6 = scalar_lea.vmem [#allocation11], %s2460_s13 }
  0x94   : > { %s270_s8 = sshll.u32 %s262_s6, 4  ;;  %p4278_p2 = scmp.lt.s32.totalorder %s3423_s28, 4  ;;  %s3741_s8 = int_to_ptr.vmem [resolvable:$true] %s270_s8 }
  0x95   : > { %s3259_s24 = scalar_lea.hbm %s3733_s17, 512  ;;  %s3264_s21 = scalar_lea.hbm %s4222_s4, 1024 }
  0x96   : > { %p3737_p5 = pnand %p4278_p2, %p142_p10  ;;  %p3260_p1 = scmp.ne.s32.totalorder %s3733_s17, %s3259_s24 }
  0x97   : > { %p3265_p11 = scmp.lt.u32.totalorder %s3733_s17, %s4222_s4  ;;  %p3266_p3 = scmp.lt.u32.totalorder %s3264_s21, %s3259_s24 }
  0x98   : > { %p3261_p9 = pneg %p3737_p5  ;;  %p3268_p13 = scmp.lt.u32.totalorder %s3259_s24, %s3733_s17 }
  0x99   : > { %p3267_p8 = por %p3266_p3, %p3265_p11 }
  0x9a   : > { %p3262_p6 = pnand %p3261_p9, %p3260_p1 }
  0x9b   : > { %p3269_p0 = por %p3268_p13, %p3267_p8 }
  0x9c   : > { %p3263_p7 = pneg %p3262_p6 }
  0x9e   : > { %p3270_p12 = pnand %p3269_p0, %p3263_p7 }
  0xa0   : > { %3273 = shalt.err (!%p3270_p12)
}
  0xa1   : > { %s3274_s13 = scalar_lea.vmem %s3741_s8, 512  ;;  %s3431_s11 = smov [#allocation11]  }
  0xa2   : > { %p3275_p4 = scmp.ne.s32.totalorder %s3741_s8, %s3274_s13  ;;  %s3279_s16 = sshll.u32 %s3431_s11, 4  ;;  %s3280_s16 = int_to_ptr.vmem [resolvable:$false] %s3279_s16 }
  0xa3   : > { %s3281_s10 = scalar_lea.vmem %s3280_s16, 1024  ;;  %p3282_p1 = scmp.lt.s32.totalorder %s3741_s8, %s3280_s16 }
  0xa4   : > { %p3277_p10 = pnand %p3275_p4, %p3261_p9  ;;  %p3283_p6 = scmp.lt.s32.totalorder %s3281_s10, %s3274_s13 }
  0xa6   : > { %p3278_p2 = pneg %p3277_p10  ;;  %p3284_p11 = por %p3283_p6, %p3282_p1 }
  0xa8   : > { %p3285_p3 = pnand %p3284_p11, %p3278_p2 }
  0xaa   : > { %3288 = shalt.err (!%p3285_p3)
}
  0xab   : > { %2886 = dma.hbm_to_vmem [thread:$0]  (!%p3737_p5), %s3733_s17, 512, %s3741_s8, %s3647_s7, %s4274_s22, %s4274_s22, %s4273_s14  }
  0xac   : > { %p4280_p9 = scmp.ne.s32.totalorder %s4262_s9, 0 }
  0xad   : > { %s4281_s6 = sld [smem:[#allocation19_spill]] (!%p4280_p9)  ;;  %s4282_s24 = sld [smem:[#allocation22_spill]] (!%p4280_p9) }
  0xae   : > { %282 = sbr.rel (%p4280_p9) target bundleno = 1845 (0x735), region = 40  ;;  %s284_s25 = sand.u32 (!%p4280_p9), 1, %s3526_s29  }
  0xaf   : > { %s285_s15 = scalar_lea.sflag (!%p4280_p9), [#allocation4], %s284_s25 }
  0xb3   : > { %s286_s1 = sand.u32 (!%p4280_p9), 1, %s4281_s6   ;;  %p4283_p7 = scmp.ne.s32.totalorder (!%p4280_p9), %s4282_s24, 0 }
  0xb4   : > { %s3778_s21 = sshll.u32 (!%p4280_p9), %s286_s1, 5 }
  0xb5   : > { %s288_s18 = scalar_lea.vmem [#allocation3], %s3778_s21 }
  0xb6   : > { %3362 = dma.done.wait (%p4283_p7), %s285_s15, 512  }
  0xb7   : > { %3364 = vsyncadd (%p4283_p7), %s285_s15, 4294966784  ;;  %p4284_p5 = scmp.eq.s32.totalorder %s3526_s29, 0 }
  0xb9   : > { %3366 = dma.done.wait (%p4284_p5), [#allocation7], 1024   ;;  %p4285_p8 = pmov %p4284_p5 }
  0xba   : > { %p4286_p13 = pmov %p4284_p5 }
  0xbb   : > { %3368 = vsyncadd (%p4285_p8), [#allocation7], 4294966272 }
  0xbc   : > { %3370 = dma.done.wait (%p4286_p13), [#allocation10], 16   ;;  %p4287_p0 = pmov %p4284_p5 }
  0xbd   : > { %s4288_s9 = sld [smem:[#allocation23_spill]]  ;;  %s307_s7 = sand.u32 1, %s3387_s19  }
  0xbe   : > { %3372 = vsyncadd (%p4287_p0), [#allocation10], 4294967280  ;;  %s2469_s14 = sshll.u32 %s307_s7, 5 }
  0xbf   : > { %s3794_s22 = scalar_lea.vmem [#allocation11], %s2469_s14 }
  0xc3   : > { %p4289_p12 = scmp.ne.s32.totalorder %s4288_s9, 0 }
  0xc5   : > { %3374 = dma.done.wait (%p4289_p12), %s285_s15, 512  }
  0xc6   : > { %3376 = vsyncadd (%p4289_p12), %s285_s15, 4294966784  ;;  %vm352_vm0 = vcmask 261120   ;;  %v348_v0 = vld [vmem:[#allocation6] sm:$0xff]  ;;  %v349_v1 = vld [vmem:[#allocation6 + $0x8] sm:$0xff]  ;;  %vm450_vm1 = vcmask 781312   ;;  %vm456_vm2 = vcmask 785412  }
  0xc7   : > { %v350_v2 = vld [vmem:[#allocation6 + $0x10] sm:$0xff]  ;;  %v2756_v3 = vpack.c.bf16 %v349_v1, %v348_v0  ;;  %v351_v4 = vld [vmem:[#allocation6 + $0x18] sm:$0xff]  ;;  %v344_v5 = vld [vmem:[%s288_s18] sm:$0xff]  ;;  %vm501_vm3 = vcmask 64512   ;;  %s3432_s29 = smov 120   ;;  %s3433_s17 = smov 112  }
  0xc8   : > { %v2760_v6 = vpack.c.bf16 %v351_v4, %v350_v2  ;;  %2624 = vmatprep.mubr.msk.f32.mxu1 %vm352_vm0, %v344_v5  ;;  %v345_v7 = vld [vmem:[%s288_s18 + $0x8] sm:$0xff]  ;;  %v346_v8 = vld [vmem:[%s288_s18 + $0x10] sm:$0xff]  ;;  %v347_v9 = vld [vmem:[%s288_s18 + $0x18] sm:$0xff]  ;;  %s3434_s8 = smov 104   ;;  %s3435_s12 = smov 96   ;;  %vm1194_vm5 = vcmask 130048  }
  0xc9   : > { %2757 = vmatprep.subr.bf16.mxu1 %v2756_v3  ;;  %vm3853_vm4 = vmpackc.low %vm501_vm3, %vm501_vm3  ;;  %s3436_s13 = smov 64   ;;  %s3437_s11 = smov 8   ;;  %vm2171_vm6 = vcmask 195584   ;;  %vm2284_vm7 = vcmask 257024   ;;  %vm2286_vm8 = vcmask 261124  }
  0xca   : > { %2759 = vmatpush3.bf16.msra.mxu1 %v2756_v3  ;;  %s3438_s16 = smov 16   ;;  %s3439_s10 = smov 24  }
  0xcb   : > { %2761 = vmatprep.subr.bf16.mxu1 %v2760_v6  ;;  %s4292_s24 = sld [smem:[#allocation21_spill]]  ;;  %s4293_s25 = sld [smem:[#allocation20_spill]] }
  0xcc   : > { %s340_s15 = scalar_lea.vmem [#allocation12], %s3778_s21  ;;  %s4294_s14 = sld [smem:[#allocation26_spill]] }
  0xce   : > { %2763 = vmatpush3.bf16.msra.mxu1 %v2760_v6 }
  0xd1   : > { %2625 = vmatmul.mubr.msk.f32.vlgmr.msra.gmra.mrb[0].mxu1 %vm352_vm0, %v345_v7  ;;  %s2529_s18 = sshll.u32 %s4292_s24, 2  ;;  %s2530_s9 = sshll.u32 %s4293_s25, 3 }
  0xd2   : > { %2627 = vmatprep.mubr.msk.f32.mxu1 %vm352_vm0, %v346_v8  ;;  %s2307_s7 = sadd.s32 %s2530_s9, %s2529_s18  ;;  %p4296_p10 = scmp.ne.s32.totalorder %s4294_s14, 0 }
  0xd5   : > { %2628 = vmatmul.mubr.msk.f32.gmra.mrb[2].mxu1 %vm352_vm0, %v347_v9 }
 0x1a4   : > { %v2626_v10 = vpop.f32.mrb[0].mxu1 }
 0x1a5   : > { %452 = vst.msk [vmem:[#allocation2 + $0x4] sm:$0xf] %vm450_vm1, %v2626_v10  ;;  %v431_v11 = vpop.f32.mrb[1].mxu1 }
 0x1a6   : > { %458 = vst.msk [vmem:[#allocation2 + $0x10] sm:$0xf0] %vm456_vm2, %v2626_v10  ;;  %457 = vst.msk [vmem:[#allocation2 + $0xc] sm:$0xf0] %vm456_vm2, %v431_v11 }
 0x1a7   : > { %451 = vst.msk [vmem:[#allocation2] sm:$0xf] %vm450_vm1, %v431_v11  ;;  %v494_v11 = vld [vmem:[%s3794_s22 + $0x8] sm:$0xff] }
 0x1a8   : > { %v2629_v12 = vpop.f32.mrb[2].mxu1 }
 0x1a9   : > { %454 = vst.msk [vmem:[#allocation2 + $0xc] sm:$0xf] %vm450_vm1, %v2629_v12  ;;  %v441_v13 = vpop.f32.mrb[3].mxu1 }
 0x1aa   : > { %460 = vst.msk [vmem:[#allocation2 + $0x18] sm:$0xf0] %vm456_vm2, %v2629_v12  ;;  %459 = vst.msk [vmem:[#allocation2 + $0x14] sm:$0xf0] %vm456_vm2, %v441_v13 }
 0x1ab   : > { %453 = vst.msk [vmem:[#allocation2 + $0x8] sm:$0xf] %vm450_vm1, %v441_v13  ;;  %v493_v13 = vld [vmem:[%s3794_s22] sm:$0xff] }
 0x1ad   : > { %v463_v14 = vld [vmem:[#allocation2 + $0x10] sm:$0xff] }
 0x1ae   : > { %v461_v15 = vld [vmem:[#allocation2] sm:$0xff]  ;;  %473 = vrot.lane.b32.xlu1 %v463_v14, %s3432_s29  ;;  %2641 = vmatprep.mubr.msk.f32.mxu0 %vm501_vm3, %v463_v14 }
 0x1af   : > { %469 = vrot.lane.b32.xlu0 %v461_v15, %s3432_s29  ;;  %2634 = vmatprep.mubr.msk.f32.mxu1 %vm501_vm3, %v461_v15 }
 0x1b1   : > { %v464_v16 = vld [vmem:[#allocation2 + $0x18] sm:$0xff] }
 0x1b2   : > { %v462_v17 = vld [vmem:[#allocation2 + $0x8] sm:$0xff]  ;;  %475 = vrot.lane.b32.xlu1 %v464_v16, %s3432_s29  ;;  %v3806_v18 = vpack.i.bf16 %v464_v16, %v463_v14 }
 0x1b3   : > { %471 = vrot.lane.b32.xlu0 %v462_v17, %s3432_s29  ;;  %v3001_v19 = vpack.i.bf16 %v462_v17, %v461_v15  ;;  %s2310_s29 = sshll.u32 %s340_s15, 4  ;;  %s4148_s29 = int_to_ptr.vmem [resolvable:$true] %s2310_s29 }
 0x1b6   : > { %479 = vrot.lane.b32.xlu1 %v462_v17, %s3433_s17 }
 0x1b7   : > { %477 = vrot.lane.b32.xlu0 %v461_v15, %s3433_s17 }
 0x1ba   : > { %483 = vrot.lane.b32.xlu1 %v464_v16, %s3433_s17 }
 0x1bb   : > { %481 = vrot.lane.b32.xlu0 %v463_v14, %s3433_s17 }
 0x1be   : > { %487 = vrot.lane.b32.xlu1 %v462_v17, %s3434_s8 }
 0x1bf   : > { %485 = vrot.lane.b32.xlu0 %v461_v15, %s3434_s8  ;;  %v496_v15 = vld [vmem:[%s3794_s22 + $0x18] sm:$0xff] }
 0x1c2   : > { %491 = vrot.lane.b32.xlu1 %v464_v16, %s3434_s8 }
 0x1c3   : > { %489 = vrot.lane.b32.xlu0 %v463_v14, %s3434_s8  ;;  %s4295_s8 = sld [smem:[#allocation29_spill]] }
 0x1c6   : > { %3007 = vrot.lane.b32.xlu1 %v3806_v18, %s3435_s12 }
 0x1c7   : > { %3002 = vrot.lane.b32.xlu0 %v3001_v19, %s3435_s12 }
 0x220   : > { %v474_v20 = vpop.permute.xlu1 %473 }
 0x221   : > { %v470_v21 = vpop.permute.xlu0 %469 }
 0x224   : > { %v3809_v22 = vpop.permute.xlu1 %475 }
 0x225   : > { %v3812_v23 = vpack.i.bf16 %v3809_v22, %v474_v20  ;;  %v3814_v24 = vpop.permute.xlu0 %471 }
 0x226   : > { %v3817_v25 = vpack.i.bf16 %v3814_v24, %v470_v21 }
 0x227   : > { %3017 = vrot.lane.b32.xlu1 %v3812_v23, %s3435_s12 }
 0x228   : > { %3012 = vrot.lane.b32.xlu0 %v3817_v25, %s3435_s12  ;;  %v3821_v26 = vpop.permute.xlu1 %479 }
 0x229   : > { %v478_v27 = vpop.permute.xlu0 %477 }
 0x22a   : > { %v3824_v28 = vpack.i.bf16 %v3821_v26, %v478_v27 }
 0x22c   : > { %3022 = vrot.lane.b32.xlu0 %v3824_v28, %s3435_s12  ;;  %v3827_v29 = vpop.permute.xlu1 %483 }
 0x22d   : > { %v482_v30 = vpop.permute.xlu0 %481 }
 0x22e   : > { %v3830_v31 = vpack.i.bf16 %v3827_v29, %v482_v30 }
 0x230   : > { %3027 = vrot.lane.b32.xlu1 %v3830_v31, %s3435_s12  ;;  %v3833_v32 = vpop.permute.xlu1 %487 }
 0x231   : > { %v3835_v33 = vpop.permute.xlu0 %485 }
 0x232   : > { %v3839_v34 = vpack.i.bf16 %v3833_v32, %v3835_v33 }
 0x234   : > { %3032 = vrot.lane.b32.xlu0 %v3839_v34, %s3435_s12  ;;  %v3842_v35 = vpop.permute.xlu1 %491 }
 0x235   : > { %v3844_v36 = vpop.permute.xlu0 %489 }
 0x236   : > { %v3848_v37 = vpack.i.bf16 %v3842_v35, %v3844_v36 }
 0x238   : > { %3037 = vrot.lane.b32.xlu1 %v3848_v37, %s3435_s12  ;;  %v3008_v38 = vpop.permute.xlu1 %3007 }
 0x239   : > { %v3010_v39 = vunpack.i.h.bf16 %v3008_v38  ;;  %v3009_v40 = vunpack.i.l.bf16 %v3008_v38  ;;  %v3003_v41 = vpop.permute.xlu0 %3002 }
 0x23a   : > { %v3005_v42 = vunpack.i.h.bf16 %v3003_v41  ;;  %v3004_v43 = vunpack.i.l.bf16 %v3003_v41 }
 0x23b   : > { %v2770_v45 = vpack.c.bf16 %v3010_v39, %v3009_v40 }
 0x23c   : > { %v2764_v46 = vpack.c.bf16 %v3005_v42, %v3004_v43  ;;  %3042 = vrot.lane.b32.xlu1 %v3001_v19, %s3436_s13 }
 0x23d   : > { %2772 = vmatprep.subr.msk.bf16.mxu0 %vm3853_vm4, %v2770_v45 }
 0x23e   : > { %2766 = vmatprep.subr.msk.bf16.mxu1 %vm3853_vm4, %v2764_v46  ;;  %2775 = vmatpush3.bf16.xpose.msk.msra.mxu0 %vm3853_vm4, %v2770_v45 }
 0x23f   : > { %2769 = vmatpush3.bf16.xpose.msk.msra.mxu1 %vm3853_vm4, %v2764_v46 }
 0x245   : > { %2642 = vmatmul.mubr.msk.f32.vlgmr.msra.gmra.mrb[0].mxu0 %vm501_vm3, %v464_v16 }
 0x246   : > { %2635 = vmatmul.mubr.msk.f32.vlgmr.msra.gmra.mrb[4].mxu1 %vm501_vm3, %v462_v17  ;;  %2655 = vmatprep.mubr.msk.f32.mxu0 %vm501_vm3, %v474_v20  ;;  %v3918_v20 = vld [vmem:[%s3794_s22 + $0x10] sm:$0xff]  ;;  %s2531_s22 = sshll.u32 %s2307_s7, 7 }
 0x247   : > { %2648 = vmatprep.mubr.msk.f32.mxu1 %vm501_vm3, %v470_v21  ;;  %s4146_s12 = scalar_lea.hbm %s4295_s8, %s2531_s22 }
 0x299   : > { %v3018_v47 = vpop.permute.xlu1 %3017 }
 0x29a   : > { %v3020_v48 = vunpack.i.h.bf16 %v3018_v47  ;;  %v3019_v49 = vunpack.i.l.bf16 %v3018_v47  ;;  %v3013_v50 = vpop.permute.xlu0 %3012 }
 0x29b   : > { %v3015_v51 = vunpack.i.h.bf16 %v3013_v50  ;;  %v3014_v52 = vunpack.i.l.bf16 %v3013_v50 }
 0x29c   : > { %v2782_v53 = vpack.c.bf16 %v3020_v48, %v3019_v49 }
 0x29d   : > { %v2776_v54 = vpack.c.bf16 %v3015_v51, %v3014_v52 }
 0x29e   : > { %v3023_v55 = vpop.permute.xlu0 %3022  ;;  %2784 = vmatprep.subr.msk.bf16.mxu0 %vm3853_vm4, %v2782_v53 }
 0x29f   : > { %v3025_v56 = vunpack.i.h.bf16 %v3023_v55  ;;  %v3024_v57 = vunpack.i.l.bf16 %v3023_v55  ;;  %2778 = vmatprep.subr.msk.bf16.mxu1 %vm3853_vm4, %v2776_v54  ;;  %2787 = vmatpush3.bf16.xpose.msk.msra.mxu0 %vm3853_vm4, %v2782_v53 }
 0x2a0   : > { %2781 = vmatpush3.bf16.xpose.msk.msra.mxu1 %vm3853_vm4, %v2776_v54 }
 0x2a1   : > { %v2788_v58 = vpack.c.bf16 %v3025_v56, %v3024_v57 }
 0x2a2   : > { %v3028_v59 = vpop.permute.xlu1 %3027 }
 0x2a3   : > { %v3030_v60 = vunpack.i.h.bf16 %v3028_v59  ;;  %v3029_v61 = vunpack.i.l.bf16 %v3028_v59  ;;  %2790 = vmatprep.subr.msk.bf16.mxu1 %vm3853_vm4, %v2788_v58 }
 0x2a5   : > { %v2794_v62 = vpack.c.bf16 %v3030_v60, %v3029_v61 }
 0x2a6   : > { %v3033_v63 = vpop.permute.xlu0 %3032  ;;  %2656 = vmatmul.mubr.msk.f32.vlgmr.msra.gmra.mrb[2].mxu0 %vm501_vm3, %v3809_v22 }
 0x2a7   : > { %v3035_v0 = vunpack.i.h.bf16 %v3033_v63  ;;  %v3034_v1 = vunpack.i.l.bf16 %v3033_v63  ;;  %2649 = vmatmul.mubr.msk.f32.vlgmr.msra.gmra.mrb[6].mxu1 %vm501_vm3, %v3814_v24  ;;  %2796 = vmatprep.subr.msk.bf16.mxu0 %vm3853_vm4, %v2794_v62 }
 0x2a8   : > { %2793 = vmatpush3.bf16.xpose.msk.msra.mxu1 %vm3853_vm4, %v2788_v58  ;;  %2662 = vmatprep.mubr.msk.f32.mxu1 %vm501_vm3, %v478_v27 }
 0x2a9   : > { %v2800_v2 = vpack.c.bf16 %v3035_v0, %v3034_v1  ;;  %2799 = vmatpush3.bf16.xpose.msk.msra.mxu0 %vm3853_vm4, %v2794_v62  ;;  %2669 = vmatprep.mubr.msk.f32.mxu0 %vm501_vm3, %v482_v30 }
 0x2aa   : > { %v3038_v3 = vpop.permute.xlu1 %3037 }
 0x2ab   : > { %v3040_v4 = vunpack.i.h.bf16 %v3038_v3  ;;  %v3039_v5 = vunpack.i.l.bf16 %v3038_v3  ;;  %2802 = vmatprep.subr.msk.bf16.mxu1 %vm3853_vm4, %v2800_v2 }
 0x2ad   : > { %v2806_v6 = vpack.c.bf16 %v3040_v4, %v3039_v5 }
 0x2ae   : > { %v3043_v7 = vpop.permute.xlu1 %3042 }
 0x2af   : > { %v3045_v8 = vunpack.i.h.bf16 %v3043_v7  ;;  %v3044_v9 = vunpack.i.l.bf16 %v3043_v7  ;;  %2663 = vmatmul.mubr.msk.f32.vlgmr.msra.gmra.mrb[8].mxu1 %vm501_vm3, %v3821_v26  ;;  %2808 = vmatprep.subr.msk.bf16.mxu0 %vm3853_vm4, %v2806_v6 }
 0x2b0   : > { %2670 = vmatmul.mubr.msk.f32.vlgmr.msra.gmra.mrb[4].mxu0 %vm501_vm3, %v3827_v29  ;;  %2805 = vmatpush3.bf16.xpose.msk.msra.mxu1 %vm3853_vm4, %v2800_v2 }
 0x2b1   : > { %v2812_v10 = vpack.c.bf16 %v3045_v8, %v3044_v9  ;;  %2676 = vmatprep.mubr.msk.f32.mxu1 %vm501_vm3, %v3835_v33  ;;  %2811 = vmatpush3.bf16.xpose.msk.msra.mxu0 %vm3853_vm4, %v2806_v6 }
 0x2b2   : > { %2683 = vmatprep.mubr.msk.f32.mxu0 %vm501_vm3, %v3844_v36 }
 0x2b3   : > { %2813 = vmatprep.subr.bf16.mxu1 %v2812_v10 }
 0x2b7   : > { %2677 = vmatmul.mubr.msk.f32.vlgmr.msra.gmra.mrb[10].mxu1 %vm501_vm3, %v3833_v32 }
 0x2b8   : > { %2684 = vmatmul.mubr.msk.f32.vlgmr.msra.gmra.mrb[6].mxu0 %vm501_vm3, %v3842_v35  ;;  %2815 = vmatpush3.bf16.msra.mxu1 %v2812_v10 }
 0x318   : > { %v2643_v12 = vpop.f32.mrb[0].mxu0 }
 0x319   : > { %v2636_v14 = vpop.f32.mrb[4].mxu1  ;;  %v663_v16 = vpop.f32.mrb[1].mxu0  ;;  %v3922_v22 = vadd.f32 %v2643_v12, %v496_v15 }
 0x31a   : > { %v3915_v17 = vadd.f32 %v2636_v14, %v494_v11  ;;  %v576_v19 = vpop.f32.mrb[5].mxu1  ;;  %v3927_v26 = vadd.f32 %v663_v16, %v3918_v20 }
 0x31b   : > { %v3920_v21 = vadd.f32 %v576_v19, %v493_v13  ;;  %v1204_v29 = vsel %vm1194_vm5, %v3922_v22, -inf }
 0x31c   : > { %v1198_v24 = vsel %vm1194_vm5, %v3915_v17, -inf  ;;  %v1201_v30 = vsel %vm1194_vm5, %v3927_v26, -inf }
 0x31d   : > { %1199 = vmax.xlane.f32.xlu1 %v1198_v24  ;;  %v1195_v27 = vsel %vm1194_vm5, %v3920_v21, -inf }
 0x31e   : > { %1196 = vmax.xlane.f32.xlu0 %v1195_v27 }
 0x321   : > { %1205 = vmax.xlane.f32.xlu1 %v1204_v29 }
 0x322   : > { %1202 = vmax.xlane.f32.xlu0 %v1201_v30 }
 0x379   : > { %v2657_v32 = vpop.f32.mrb[2].mxu0 }
 0x37a   : > { %v2650_v33 = vpop.f32.mrb[6].mxu1  ;;  %v3935_v35 = vadd.f32 %v2657_v32, %v496_v15  ;;  %v837_v36 = vpop.f32.mrb[3].mxu0 }
 0x37b   : > { %v3937_v38 = vadd.f32 %v2650_v33, %v494_v11  ;;  %v750_v39 = vpop.f32.mrb[7].mxu1  ;;  %v3940_v40 = vadd.f32 %v837_v36, %v3918_v20 }
 0x37c   : > { %v1216_v41 = vsel %vm1194_vm5, %v3935_v35, -inf  ;;  %v3944_v42 = vadd.f32 %v750_v39, %v493_v13 }
 0x37d   : > { %1217 = vmax.xlane.f32.xlu1 %v1216_v41  ;;  %v1210_v43 = vsel %vm1194_vm5, %v3937_v38, -inf  ;;  %v1213_v44 = vsel %vm1194_vm5, %v3940_v40, -inf }
 0x37e   : > { %1211 = vmax.xlane.f32.xlu0 %v1210_v43  ;;  %v1207_v45 = vsel %vm1194_vm5, %v3944_v42, -inf }
 0x381   : > { %1214 = vmax.xlane.f32.xlu1 %v1213_v44 }
 0x382   : > { %v2664_v46 = vpop.f32.mrb[8].mxu1  ;;  %1208 = vmax.xlane.f32.xlu0 %v1207_v45 }
 0x383   : > { %v2671_v47 = vpop.f32.mrb[4].mxu0  ;;  %v3952_v48 = vadd.f32 %v2664_v46, %v494_v11  ;;  %v924_v49 = vpop.f32.mrb[9].mxu1 }
 0x384   : > { %v3954_v50 = vadd.f32 %v2671_v47, %v496_v15  ;;  %v1011_v51 = vpop.f32.mrb[5].mxu0  ;;  %v3956_v52 = vadd.f32 %v924_v49, %v493_v13 }
 0x385   : > { %v1222_v53 = vsel %vm1194_vm5, %v3952_v48, -inf  ;;  %v3961_v54 = vadd.f32 %v1011_v51, %v3918_v20 }
 0x386   : > { %v1228_v55 = vsel %vm1194_vm5, %v3954_v50, -inf  ;;  %1223 = vmax.xlane.f32.xlu0 %v1222_v53  ;;  %v1219_v56 = vsel %vm1194_vm5, %v3956_v52, -inf }
 0x387   : > { %1229 = vmax.xlane.f32.xlu1 %v1228_v55  ;;  %v1225_v57 = vsel %vm1194_vm5, %v3961_v54, -inf }
 0x38a   : > { %v2678_v58 = vpop.f32.mrb[10].mxu1  ;;  %1220 = vmax.xlane.f32.xlu0 %v1219_v56 }
 0x38b   : > { %v2685_v59 = vpop.f32.mrb[6].mxu0  ;;  %1226 = vmax.xlane.f32.xlu1 %v1225_v57  ;;  %v3969_v60 = vadd.f32 %v2678_v58, %v494_v11  ;;  %v1098_v61 = vpop.f32.mrb[11].mxu1 }
 0x38c   : > { %v1185_v62 = vpop.f32.mrb[7].mxu0  ;;  %v3971_v63 = vadd.f32 %v2685_v59, %v496_v15  ;;  %v3975_v1 = vadd.f32 %v1098_v61, %v493_v13 }
 0x38d   : > { %v1234_v0 = vsel %vm1194_vm5, %v3969_v60, -inf  ;;  %v3991_v7 = vadd.f32 %v1185_v62, %v3918_v20 }
 0x38e   : > { %1235 = vmax.xlane.f32.xlu0 %v1234_v0  ;;  %v1240_v2 = vsel %vm1194_vm5, %v3971_v63, -inf  ;;  %v1231_v3 = vsel %vm1194_vm5, %v3975_v1, -inf }
 0x392   : > { %1241 = vmax.xlane.f32.xlu0 %v1240_v2 }
 0x396   : > { %1232 = vmax.xlane.f32.xlu0 %v1231_v3 }
 0x39c   : > { %3052 = vrot.lane.b32.xlu1 %v3817_v25, %s3436_s13  ;;  %v1237_v25 = vsel %vm1194_vm5, %v3991_v7, -inf }
 0x3a0   : > { %3057 = vrot.lane.b32.xlu1 %v3812_v23, %s3436_s13 }
 0x3aa   : > { %v1200_v4 = vpop.xlane.xlu1 %1199 }
 0x3ab   : > { %v1244_v5 = vsub.f32 %v3915_v17, %v1200_v4 }
 0x3ac   : > { %3047 = vrot.lane.b32.xlu0 %v3806_v18, %s3436_s13 }
 0x3ad   : > { %v1261_v6 = vmul.f32 1.442695, %v1244_v5 }
 0x3ae   : > { %v1206_v23 = vpop.xlane.xlu1 %1205 }
 0x3af   : > { %3081 = vpow2.f32 %v1261_v6  ;;  %v1246_v9 = vsub.f32 %v3922_v22, %v1206_v23 }
 0x3b0   : > { %3062 = vrot.lane.b32.xlu0 %v3824_v28, %s3436_s13  ;;  %v1197_v28 = vpop.xlane.xlu0 %1196 }
 0x3b1   : > { %v1243_v10 = vsub.f32 %v3920_v21, %v1197_v28  ;;  %v1265_v11 = vmul.f32 1.442695, %v1246_v9 }
 0x3b3   : > { %v1259_v13 = vmul.f32 1.442695, %v1243_v10  ;;  %3083 = vpow2.f32 %v1265_v11 }
 0x3b4   : > { %v1203_v12 = vpop.xlane.xlu0 %1202 }
 0x3b5   : > { %v1245_v14 = vsub.f32 %v3927_v26, %v1203_v12  ;;  %3085 = vpow2.f32 %v1259_v13 }
 0x3b7   : > { %v1263_v15 = vmul.f32 1.442695, %v1245_v14 }
 0x3b9   : > { %v3995_v8 = vpop.eup %3081  ;;  %3087 = vpow2.f32 %v1263_v15 }
 0x3ba   : > { %v1294_v18 = vsel %vm1194_vm5, %v3995_v8, 0.0 }
 0x3bd   : > { %v4004_v16 = vpop.eup %3083 }
 0x3bf   : > { %v4008_v17 = vpop.eup %3085 }
 0x3c0   : > { %v1291_v19 = vsel %vm1194_vm5, %v4008_v17, 0.0 }
 0x3c3   : > { %v4012_v20 = vpop.eup %3087 }
 0x3c4   : > { %1238 = vmax.xlane.f32.xlu1 %v1237_v25  ;;  %v1297_v21 = vsel %vm1194_vm5, %v4012_v20, 0.0 }
 0x3cf   : > { %1295 = vadd.xlane.f32.xlu0 %v1294_v18 }
 0x3d5   : > { %3067 = vrot.lane.b32.xlu1 %v3830_v31, %s3436_s13  ;;  %v1300_v31 = vsel %vm1194_vm5, %v4004_v16, 0.0 }
 0x3f9   : > { %1301 = vadd.xlane.f32.xlu1 %v1300_v31 }
 0x3fd   : > { %1292 = vadd.xlane.f32.xlu1 %v1291_v19 }
 0x401   : > { %1298 = vadd.xlane.f32.xlu1 %v1297_v21 }
 0x40a   : > { %v1218_v22 = vpop.xlane.xlu1 %1217 }
 0x40b   : > { %v1250_v24 = vsub.f32 %v3935_v35, %v1218_v22  ;;  %v1212_v26 = vpop.xlane.xlu0 %1211 }
 0x40c   : > { %v1248_v27 = vsub.f32 %v3937_v38, %v1212_v26 }
 0x40d   : > { %v1273_v29 = vmul.f32 1.442695, %v1250_v24 }
 0x40e   : > { %v1269_v30 = vmul.f32 1.442695, %v1248_v27  ;;  %v1215_v32 = vpop.xlane.xlu1 %1214 }
 0x40f   : > { %3089 = vpow2.f32 %v1273_v29  ;;  %v1249_v33 = vsub.f32 %v3940_v40, %v1215_v32  ;;  %v1209_v36 = vpop.xlane.xlu0 %1208 }
 0x410   : > { %3091 = vpow2.f32 %v1269_v30  ;;  %v1247_v39 = vsub.f32 %v3944_v42, %v1209_v36 }
 0x411   : > { %v1271_v41 = vmul.f32 1.442695, %v1249_v33 }
 0x412   : > { %v1267_v43 = vmul.f32 1.442695, %v1247_v39 }
 0x413   : > { %3093 = vpow2.f32 %v1271_v41  ;;  %v1224_v44 = vpop.xlane.xlu0 %1223 }
 0x414   : > { %3095 = vpow2.f32 %v1267_v43  ;;  %v1230_v45 = vpop.xlane.xlu1 %1229  ;;  %v1252_v35 = vsub.f32 %v3952_v48, %v1224_v44 }
 0x415   : > { %v1254_v38 = vsub.f32 %v3954_v50, %v1230_v45 }
 0x416   : > { %v1277_v46 = vmul.f32 1.442695, %v1252_v35 }
 0x417   : > { %v1281_v47 = vmul.f32 1.442695, %v1254_v38  ;;  %v1221_v49 = vpop.xlane.xlu0 %1220 }
 0x418   : > { %3097 = vpow2.f32 %v1277_v46  ;;  %v1227_v51 = vpop.xlane.xlu1 %1226  ;;  %v1251_v40 = vsub.f32 %v3956_v52, %v1221_v49 }
 0x419   : > { %v4023_v53 = vpop.eup %3089  ;;  %3099 = vpow2.f32 %v1281_v47  ;;  %v1253_v42 = vsub.f32 %v3961_v54, %v1227_v51 }
 0x41a   : > { %v4026_v55 = vpop.eup %3091  ;;  %v1275_v56 = vmul.f32 1.442695, %v1251_v40  ;;  %v1312_v48 = vsel %vm1194_vm5, %v4023_v53, 0.0 }
 0x41b   : > { %v1279_v57 = vmul.f32 1.442695, %v1253_v42  ;;  %v1236_v50 = vpop.xlane.xlu0 %1235  ;;  %1313 = vadd.xlane.f32.xlu1 %v1312_v48  ;;  %v1306_v58 = vsel %vm1194_vm5, %v4026_v55, 0.0 }
 0x41c   : > { %3101 = vpow2.f32 %v1275_v56  ;;  %v3053_v59 = vpop.permute.xlu1 %3052  ;;  %v1256_v52 = vsub.f32 %v3969_v60, %v1236_v50  ;;  %1307 = vadd.xlane.f32.xlu0 %v1306_v58 }
 0x41d   : > { %v4033_v61 = vpop.eup %3093  ;;  %3103 = vpow2.f32 %v1279_v57  ;;  %v3055_v54 = vunpack.i.h.bf16 %v3053_v59  ;;  %v3054_v62 = vunpack.i.l.bf16 %v3053_v59 }
 0x41e   : > { %v4035_v0 = vpop.eup %3095  ;;  %v1285_v2 = vmul.f32 1.442695, %v1256_v52  ;;  %v1309_v3 = vsel %vm1194_vm5, %v4033_v61, 0.0 }
 0x41f   : > { %v2820_v4 = vpack.c.bf16 %v3055_v54, %v3054_v62  ;;  %v1242_v5 = vpop.xlane.xlu0 %1241  ;;  %1310 = vadd.xlane.f32.xlu1 %v1309_v3  ;;  %v1303_v6 = vsel %vm1194_vm5, %v4035_v0, 0.0 }
 0x420   : > { %3105 = vpow2.f32 %v1285_v2  ;;  %v1258_v60 = vsub.f32 %v3971_v63, %v1242_v5  ;;  %1304 = vadd.xlane.f32.xlu0 %v1303_v6  ;;  %v3058_v41 = vpop.permute.xlu1 %3057 }
 0x421   : > { %2821 = vmatprep.subr.bf16.mxu0 %v2820_v4  ;;  %v3060_v2 = vunpack.i.h.bf16 %v3058_v41  ;;  %v3059_v3 = vunpack.i.l.bf16 %v3058_v41 }
 0x422   : > { %v4042_v25 = vpop.eup %3097  ;;  %v1289_v18 = vmul.f32 1.442695, %v1258_v60  ;;  %2823 = vmatpush3.bf16.msra.mxu0 %v2820_v4 }
 0x423   : > { %v4044_v23 = vpop.eup %3099  ;;  %v1233_v28 = vpop.xlane.xlu0 %1232  ;;  %v1318_v9 = vsel %vm1194_vm5, %v4042_v25, 0.0 }
 0x424   : > { %3107 = vpow2.f32 %v1289_v18  ;;  %v1255_v10 = vsub.f32 %v3975_v1, %v1233_v28  ;;  %v1324_v11 = vsel %vm1194_vm5, %v4044_v23, 0.0  ;;  %1319 = vadd.xlane.f32.xlu0 %v1318_v9  ;;  %v2824_v28 = vpack.c.bf16 %v3060_v2, %v3059_v3 }
 0x425   : > { %1325 = vadd.xlane.f32.xlu1 %v1324_v11 }
 0x426   : > { %v4051_v63 = vpop.eup %3101  ;;  %v1283_v12 = vmul.f32 1.442695, %v1255_v10 }
 0x427   : > { %v4053_v13 = vpop.eup %3103  ;;  %v3048_v14 = vpop.permute.xlu0 %3047  ;;  %v1315_v15 = vsel %vm1194_vm5, %v4051_v63, 0.0 }
 0x428   : > { %3109 = vpow2.f32 %v1283_v12  ;;  %v3050_v31 = vunpack.i.h.bf16 %v3048_v14  ;;  %v3049_v19 = vunpack.i.l.bf16 %v3048_v14  ;;  %v1321_v1 = vsel %vm1194_vm5, %v4053_v13, 0.0  ;;  %1316 = vadd.xlane.f32.xlu0 %v1315_v15 }
 0x429   : > { %1322 = vadd.xlane.f32.xlu1 %v1321_v1 }
 0x42a   : > { %v4059_v21 = vpop.eup %3105  ;;  %v2816_v22 = vpack.c.bf16 %v3050_v31, %v3049_v19 }
 0x42b   : > { %v3063_v24 = vpop.permute.xlu0 %3062  ;;  %v1330_v26 = vsel %vm1194_vm5, %v4059_v21, 0.0 }
 0x42c   : > { %v3065_v27 = vunpack.i.h.bf16 %v3063_v24  ;;  %v3064_v29 = vunpack.i.l.bf16 %v3063_v24  ;;  %1331 = vadd.xlane.f32.xlu0 %v1330_v26  ;;  %2817 = vmatprep.subr.bf16.mxu1 %v2816_v22 }
 0x42e   : > { %v4063_v30 = vpop.eup %3107  ;;  %v4065_v32 = vpack.c.bf16 %v3065_v27, %v3064_v29 }
 0x42f   : > { %v1336_v33 = vsel %vm1194_vm5, %v4063_v30, 0.0 }
 0x430   : > { %1337 = vadd.xlane.f32.xlu0 %v1336_v33  ;;  %2829 = vmatprep.subr.bf16.mxu0 %v4065_v32 }
 0x432   : > { %v4070_v36 = vpop.eup %3109 }
 0x433   : > { %v1327_v39 = vsel %vm1194_vm5, %v4070_v36, 0.0 }
 0x434   : > { %1328 = vadd.xlane.f32.xlu0 %v1327_v39 }
 0x44a   : > { %3072 = vrot.lane.b32.xlu0 %v3839_v34, %s3436_s13 }
 0x451   : > { %v1239_v43 = vpop.xlane.xlu1 %1238 }
 0x452   : > { %v1257_v44 = vsub.f32 %v3991_v7, %v1239_v43 }
 0x454   : > { %v1287_v45 = vmul.f32 1.442695, %v1257_v44 }
 0x455   : > { %v3068_v47 = vpop.permute.xlu1 %3067 }
 0x456   : > { %3111 = vpow2.f32 %v1287_v45  ;;  %v3070_v9 = vunpack.i.h.bf16 %v3068_v47  ;;  %v3069_v10 = vunpack.i.l.bf16 %v3068_v47 }
 0x45c   : > { %v1296_v46 = vpop.xlane.xlu0 %1295 }
 0x45d   : > { %3113 = vrcp.f32 %v1296_v46 }
 0x460   : > { %v4077_v35 = vpop.eup %3111 }
 0x461   : > { %v1333_v38 = vsel %vm1194_vm5, %v4077_v35, 0.0 }
 0x462   : > { %1334 = vadd.xlane.f32.xlu1 %v1333_v38 }
 0x467   : > { %v3114_v51 = vpop.eup %3113 }
 0x468   : > { %v1356_v40 = vmul.f32 %v3114_v51, %v1296_v46 }
 0x46a   : > { %v1372_v48 = vsub.f32 2.0, %v1356_v40 }
 0x46c   : > { %v1388_v52 = vmul.f32 %v3114_v51, %v1372_v48 }
 0x46e   : > { %v1404_v6 = vmul.f32 %v3995_v8, %v1388_v52 }
 0x473   : > { %3077 = vrot.lane.b32.xlu1 %v3848_v37, %s3436_s13  ;;  %s4156_s13 = scalar_lea.sflag [#allocation5], %s286_s1 }
 0x486   : > { %v1302_v49 = vpop.xlane.xlu1 %1301 }
 0x487   : > { %3115 = vrcp.f32 %v1302_v49 }
 0x48a   : > { %v1293_v34 = vpop.xlane.xlu1 %1292 }
 0x48b   : > { %3117 = vrcp.f32 %v1293_v34 }
 0x48e   : > { %v1299_v7 = vpop.xlane.xlu1 %1298 }
 0x48f   : > { %3119 = vrcp.f32 %v1299_v7 }
 0x491   : > { %v3116_v42 = vpop.eup %3115 }
 0x492   : > { %v1358_v57 = vmul.f32 %v3116_v42, %v1302_v49 }
 0x494   : > { %v1374_v37 = vsub.f32 2.0, %v1358_v57 }
 0x495   : > { %v3118_v56 = vpop.eup %3117 }
 0x496   : > { %v1355_v50 = vmul.f32 %v3118_v56, %v1293_v34  ;;  %v1390_v60 = vmul.f32 %v3116_v42, %v1374_v37 }
 0x498   : > { %v1371_v58 = vsub.f32 2.0, %v1355_v50  ;;  %v1406_v12 = vmul.f32 %v4004_v16, %v1390_v60 }
 0x499   : > { %v3120_v59 = vpop.eup %3119 }
 0x49a   : > { %v1387_v54 = vmul.f32 %v3118_v56, %v1371_v58  ;;  %v1357_v62 = vmul.f32 %v3120_v59, %v1299_v7 }
 0x49c   : > { %v1403_v4 = vmul.f32 %v4008_v17, %v1387_v54  ;;  %v1373_v5 = vsub.f32 2.0, %v1357_v62  ;;  %v2832_v17 = vpack.c.bf16 %v3070_v9, %v3069_v10 }
 0x49e   : > { %v1389_v18 = vmul.f32 %v3120_v59, %v1373_v5  ;;  %2690 = vmatprep.mubr.msk.f32.mxu1 %vm1194_vm5, %v1403_v4 }
 0x49f   : > { %2691 = vmatmul.mubr.msk.f32.vlgmr.msra.gmra.mrb[12].mxu1 %vm1194_vm5, %v1404_v6 }
 0x4a0   : > { %v1405_v11 = vmul.f32 %v4012_v20, %v1389_v18  ;;  %2819 = vmatpush3.bf16.msra.mxu1 %v2816_v22 }
 0x4a1   : > { %2825 = vmatprep.subr.bf16.mxu1 %v2824_v28 }
 0x4a2   : > { %2697 = vmatprep.mubr.msk.f32.mxu1 %vm1194_vm5, %v1405_v11 }
 0x4a3   : > { %2698 = vmatmul.mubr.msk.f32.vlgmr.msra.gmra.mrb[14].mxu1 %vm1194_vm5, %v1406_v12 }
 0x4a4   : > { %2827 = vmatpush3.bf16.msra.mxu1 %v2824_v28 }
 0x4a5   : > { %2833 = vmatprep.subr.bf16.mxu1 %v2832_v17 }
 0x4a8   : > { %v1314_v8 = vpop.xlane.xlu1 %1313 }
 0x4a9   : > { %3121 = vrcp.f32 %v1314_v8  ;;  %v1308_v14 = vpop.xlane.xlu0 %1307 }
 0x4aa   : > { %3123 = vrcp.f32 %v1308_v14 }
 0x4ac   : > { %v1311_v15 = vpop.xlane.xlu1 %1310 }
 0x4ad   : > { %3125 = vrcp.f32 %v1311_v15  ;;  %v1305_v31 = vpop.xlane.xlu0 %1304 }
 0x4ae   : > { %3127 = vrcp.f32 %v1305_v31 }
 0x4b1   : > { %v1320_v20 = vpop.xlane.xlu0 %1319 }
 0x4b2   : > { %v1326_v19 = vpop.xlane.xlu1 %1325  ;;  %3129 = vrcp.f32 %v1320_v20 }
 0x4b3   : > { %v3122_v16 = vpop.eup %3121  ;;  %3131 = vrcp.f32 %v1326_v19 }
 0x4b4   : > { %v3124_v1 = vpop.eup %3123  ;;  %v1362_v22 = vmul.f32 %v3122_v16, %v1314_v8 }
 0x4b5   : > { %v1360_v24 = vmul.f32 %v3124_v1, %v1308_v14  ;;  %v1317_v26 = vpop.xlane.xlu0 %1316 }
 0x4b6   : > { %v1323_v27 = vpop.xlane.xlu1 %1322  ;;  %3133 = vrcp.f32 %v1317_v26  ;;  %v1378_v33 = vsub.f32 2.0, %v1362_v22 }
 0x4b7   : > { %v3126_v29 = vpop.eup %3125  ;;  %3135 = vrcp.f32 %v1323_v27  ;;  %v1376_v41 = vsub.f32 2.0, %v1360_v24 }
 0x4b8   : > { %v3128_v39 = vpop.eup %3127  ;;  %v1361_v43 = vmul.f32 %v3126_v29, %v1311_v15  ;;  %v1394_v46 = vmul.f32 %v3122_v16, %v1378_v33 }
 0x4b9   : > { %v1359_v44 = vmul.f32 %v3128_v39, %v1305_v31  ;;  %v1332_v45 = vpop.xlane.xlu0 %1331  ;;  %v1392_v34 = vmul.f32 %v3124_v1, %v1376_v41 }
 0x4ba   : > { %v1377_v38 = vsub.f32 2.0, %v1361_v43  ;;  %3137 = vrcp.f32 %v1332_v45  ;;  %v1410_v50 = vmul.f32 %v4023_v53, %v1394_v46 }
 0x4bb   : > { %v1375_v47 = vsub.f32 2.0, %v1359_v44  ;;  %v1408_v52 = vmul.f32 %v4026_v55, %v1392_v34 }
 0x4bc   : > { %v3130_v49 = vpop.eup %3129  ;;  %v1393_v51 = vmul.f32 %v3126_v29, %v1377_v38 }
 0x4bd   : > { %v3132_v7 = vpop.eup %3131  ;;  %v1391_v40 = vmul.f32 %v3128_v39, %v1375_v47  ;;  %v1364_v42 = vmul.f32 %v3130_v49, %v1320_v20  ;;  %v1338_v56 = vpop.xlane.xlu0 %1337 }
 0x4be   : > { %v1409_v48 = vmul.f32 %v4033_v61, %v1393_v51  ;;  %v1366_v57 = vmul.f32 %v3132_v7, %v1326_v19 }
 0x4bf   : > { %v1407_v58 = vmul.f32 %v4035_v0, %v1391_v40  ;;  %v1380_v37 = vsub.f32 2.0, %v1364_v42  ;;  %v2176_v40 = vld [vmem:[#allocation8] sm:$0xff]  ;;  %v2177_v42 = vld [vmem:[#allocation8 + $0x8] sm:$0xff] }
 0x4c0   : > { %v3134_v59 = vpop.eup %3133  ;;  %2711 = vmatprep.mubr.msk.f32.mxu1 %vm1194_vm5, %v1409_v48  ;;  %v1382_v62 = vsub.f32 2.0, %v1366_v57 }
 0x4c1   : > { %v3136_v54 = vpop.eup %3135  ;;  %v1363_v2 = vmul.f32 %v3134_v59, %v1317_v26  ;;  %2704 = vmatprep.mubr.msk.f32.mxu0 %vm1194_vm5, %v1407_v58  ;;  %v1329_v3 = vpop.xlane.xlu0 %1328  ;;  %2712 = vmatmul.mubr.msk.f32.vlgmr.msra.gmra.mrb[16].mxu1 %vm1194_vm5, %v1410_v50  ;;  %v1396_v55 = vmul.f32 %v3130_v49, %v1380_v37 }
 0x4c2   : > { %v1365_v61 = vmul.f32 %v3136_v54, %v1323_v27  ;;  %3139 = vrcp.f32 %v1329_v3  ;;  %2705 = vmatmul.mubr.msk.f32.vlgmr.msra.gmra.mrb[8].mxu0 %vm1194_vm5, %v1408_v52  ;;  %2835 = vmatpush3.bf16.msra.mxu1 %v2832_v17  ;;  %v1398_v5 = vmul.f32 %v3132_v7, %v1382_v62 }
 0x4c3   : > { %v1379_v53 = vsub.f32 2.0, %v1363_v2  ;;  %2831 = vmatpush3.bf16.msra.mxu0 %v4065_v32  ;;  %v1412_v11 = vmul.f32 %v4042_v25, %v1396_v55  ;;  %3141 = vrcp.f32 %v1338_v56 }
 0x4c4   : > { %v1381_v0 = vsub.f32 2.0, %v1365_v61  ;;  %v3138_v4 = vpop.eup %3137  ;;  %v1414_v14 = vmul.f32 %v4044_v23, %v1398_v5 }
 0x4c5   : > { %v1395_v6 = vmul.f32 %v3134_v59, %v1379_v53  ;;  %v3073_v60 = vpop.permute.xlu0 %3072  ;;  %v1368_v8 = vmul.f32 %v3138_v4, %v1332_v45 }
 0x4c6   : > { %v1397_v18 = vmul.f32 %v3136_v54, %v1381_v0  ;;  %v3075_v28 = vunpack.i.h.bf16 %v3073_v60  ;;  %v3074_v9 = vunpack.i.l.bf16 %v3073_v60 }
 0x4c7   : > { %v1411_v10 = vmul.f32 %v4051_v63, %v1395_v6  ;;  %v1384_v15 = vsub.f32 2.0, %v1368_v8 }
 0x4c8   : > { %v1413_v12 = vmul.f32 %v4053_v13, %v1397_v18  ;;  %v2836_v17 = vpack.c.bf16 %v3075_v28, %v3074_v9 }
 0x4c9   : > { %2718 = vmatprep.mubr.msk.f32.mxu0 %vm1194_vm5, %v1411_v10  ;;  %v1400_v31 = vmul.f32 %v3138_v4, %v1384_v15 }
 0x4ca   : > { %2725 = vmatprep.mubr.msk.f32.mxu1 %vm1194_vm5, %v1413_v12  ;;  %2719 = vmatmul.mubr.msk.f32.vlgmr.msra.gmra.mrb[10].mxu0 %vm1194_vm5, %v1412_v11 }
 0x4cb   : > { %2726 = vmatmul.mubr.msk.f32.vlgmr.msra.gmra.mrb[18].mxu1 %vm1194_vm5, %v1414_v14  ;;  %2837 = vmatprep.subr.bf16.mxu0 %v2836_v17  ;;  %v1416_v23 = vmul.f32 %v4059_v21, %v1400_v31 }
 0x4cc   : > { %v3140_v32 = vpop.eup %3139  ;;  %2839 = vmatpush3.bf16.msra.mxu0 %v2836_v17 }
 0x4cd   : > { %v1367_v63 = vmul.f32 %v3140_v32, %v1329_v3  ;;  %v3142_v16 = vpop.eup %3141 }
 0x4ce   : > { %v1370_v26 = vmul.f32 %v3142_v16, %v1338_v56  ;;  %v2179_v56 = vld [vmem:[#allocation8 + $0x18] sm:$0xff] }
 0x4cf   : > { %v1383_v25 = vsub.f32 2.0, %v1367_v63 }
 0x4d0   : > { %v1386_v33 = vsub.f32 2.0, %v1370_v26 }
 0x4d1   : > { %v1399_v13 = vmul.f32 %v3140_v32, %v1383_v25 }
 0x4d2   : > { %v1402_v21 = vmul.f32 %v3142_v16, %v1386_v33 }
 0x4d3   : > { %v1415_v20 = vmul.f32 %v4070_v36, %v1399_v13  ;;  %v2523_v13 = vld [vmem:[#allocation9] ss:$0 sm:$0xff] }
 0x4d4   : > { %v1418_v44 = vmul.f32 %v4063_v30, %v1402_v21  ;;  %v2844_v30 = vpack.c.bf16 %v2177_v42, %v2176_v40 }
 0x4d5   : > { %2732 = vmatprep.mubr.msk.f32.mxu0 %vm1194_vm5, %v1415_v20 }
 0x4d6   : > { %2733 = vmatmul.mubr.msk.f32.vlgmr.msra.gmra.mrb[12].mxu0 %vm1194_vm5, %v1416_v23  ;;  %2845 = vmatprep.subr.bf16.mxu0 %v2844_v30 }
 0x4d7   : > { %2847 = vmatpush3.bf16.msra.mxu0 %v2844_v30 }
 0x4ef   : > { %v1335_v19 = vpop.xlane.xlu1 %1334 }
 0x4f0   : > { %3143 = vrcp.f32 %v1335_v19 }
 0x4f3   : > { %v3078_v1 = vpop.permute.xlu1 %3077 }
 0x4f4   : > { %v3080_v22 = vunpack.i.h.bf16 %v3078_v1  ;;  %v3079_v24 = vunpack.i.l.bf16 %v3078_v1 }
 0x4f6   : > { %v2840_v27 = vpack.c.bf16 %v3080_v22, %v3079_v24 }
 0x4f8   : > { %2841 = vmatprep.subr.bf16.mxu1 %v2840_v27 }
 0x4f9   : > { %2843 = vmatpush3.bf16.msra.mxu1 %v2840_v27 }
 0x4fa   : > { %v3144_v29 = vpop.eup %3143 }
 0x4fb   : > { %v1369_v36 = vmul.f32 %v3144_v29, %v1335_v19 }
 0x4fd   : > { %v1385_v39 = vsub.f32 2.0, %v1369_v36 }
 0x4ff   : > { %v1401_v41 = vmul.f32 %v3144_v29, %v1385_v39 }
 0x501   : > { %v1417_v43 = vmul.f32 %v4077_v35, %v1401_v41  ;;  %v2178_v35 = vld [vmem:[#allocation8 + $0x10] sm:$0xff] }
 0x502   : > { %v2848_v48 = vpack.c.bf16 %v2179_v56, %v2178_v35 }
 0x503   : > { %2739 = vmatprep.mubr.msk.f32.mxu1 %vm1194_vm5, %v1417_v43 }
 0x504   : > { %2740 = vmatmul.mubr.msk.f32.vlgmr.msra.gmra.mrb[20].mxu1 %vm1194_vm5, %v1418_v44  ;;  %2849 = vmatprep.subr.bf16.mxu0 %v2848_v48 }
 0x505   : > { %2851 = vmatpush3.bf16.msra.mxu0 %v2848_v48 }
 0x572   : > { %v2692_v45 = vpop.f32.mrb[12].mxu1 }
 0x573   : > { %v1497_v38 = vpop.f32.mrb[13].mxu1 }
 0x576   : > { %v2699_v46 = vpop.f32.mrb[14].mxu1 }
 0x577   : > { %v1584_v47 = vpop.f32.mrb[15].mxu1 }
 0x594   : > { %v2713_v49 = vpop.f32.mrb[16].mxu1 }
 0x595   : > { %v2706_v34 = vpop.f32.mrb[8].mxu0  ;;  %v1758_v51 = vpop.f32.mrb[17].mxu1 }
 0x596   : > { %2121 = vrot.lane.b32.xlu1 %v2706_v34, %s3437_s11  ;;  %v1671_v7 = vpop.f32.mrb[9].mxu0 }
 0x597   : > { %2119 = vrot.lane.b32.xlu0 %v1671_v7, %s3437_s11 }
 0x59a   : > { %2125 = vrot.lane.b32.xlu1 %v2713_v49, %s3437_s11 }
 0x59b   : > { %2123 = vrot.lane.b32.xlu0 %v1758_v51, %s3437_s11 }
 0x59d   : > { %v2720_v57 = vpop.f32.mrb[10].mxu0 }
 0x59e   : > { %v2727_v50 = vpop.f32.mrb[18].mxu1  ;;  %v1845_v58 = vpop.f32.mrb[11].mxu0  ;;  %2137 = vrot.lane.b32.xlu1 %v2720_v57, %s3438_s16 }
 0x59f   : > { %v1932_v59 = vpop.f32.mrb[19].mxu1  ;;  %2135 = vrot.lane.b32.xlu0 %v1845_v58, %s3438_s16 }
 0x5a2   : > { %2141 = vrot.lane.b32.xlu1 %v2727_v50, %s3438_s16 }
 0x5a3   : > { %2139 = vrot.lane.b32.xlu0 %v1932_v59, %s3438_s16  ;;  %s3289_s16 = scalar_lea.vmem %s4148_s29, 512 }
 0x5a4   : > { %p3290_p4 = scmp.ne.s32.totalorder %s4148_s29, %s3289_s16 }
 0x5a6   : > { %p3291_p2 = pnand %p3290_p4, %p4296_p10 }
 0x5a8   : > { %p3292_p1 = pneg %p3291_p2 }
 0x5a9   : > { %v2734_v52 = vpop.f32.mrb[12].mxu0 }
 0x5aa   : > { %v2019_v37 = vpop.f32.mrb[13].mxu0  ;;  %2153 = vrot.lane.b32.xlu1 %v2734_v52, %s3439_s10 }
 0x5ab   : > { %2151 = vrot.lane.b32.xlu0 %v2019_v37, %s3439_s10 }
 0x5d7   : > { %v2741_v54 = vpop.f32.mrb[20].mxu1 }
 0x5d8   : > { %2157 = vrot.lane.b32.xlu1 %v2741_v54, %s3439_s10  ;;  %v2106_v62 = vpop.f32.mrb[21].mxu1 }
 0x5d9   : > { %2155 = vrot.lane.b32.xlu0 %v2106_v62, %s3439_s10  ;;  %s3440_s10 = smov [#allocation12]  }
 0x5da   : > { %s3293_s24 = sshll.u32 %s3440_s10, 4  ;;  %s3294_s24 = int_to_ptr.vmem [resolvable:$false] %s3293_s24 }
 0x5db   : > { %s3295_s25 = scalar_lea.vmem %s3294_s24, 1024  ;;  %p3296_p6 = scmp.lt.s32.totalorder %s4148_s29, %s3294_s24 }
 0x5dc   : > { %p3297_p11 = scmp.lt.s32.totalorder %s3295_s25, %s3289_s16 }
 0x5de   : > { %p3298_p3 = por %p3297_p11, %p3296_p6 }
 0x5e0   : > { %p3299_p9 = pnand %p3298_p3, %p3292_p1 }
 0x608   : > { %v2122_v2 = vpop.permute.xlu1 %2121 }
 0x609   : > { %v2120_v3 = vpop.permute.xlu0 %2119  ;;  %v2164_v18 = vsel %vm501_vm3, %v2692_v45, %v2122_v2 }
 0x60a   : > { %v2163_v6 = vsel %vm501_vm3, %v1497_v38, %v2120_v3 }
 0x60c   : > { %v2126_v61 = vpop.permute.xlu1 %2125 }
 0x60d   : > { %v2124_v53 = vpop.permute.xlu0 %2123  ;;  %v2166_v14 = vsel %vm501_vm3, %v2699_v46, %v2126_v61 }
 0x60e   : > { %v2165_v8 = vsel %vm501_vm3, %v1584_v47, %v2124_v53 }
 0x610   : > { %v2138_v55 = vpop.permute.xlu1 %2137 }
 0x611   : > { %v2136_v0 = vpop.permute.xlu0 %2135  ;;  %v2168_v10 = vsel %vm1194_vm5, %v2164_v18, %v2138_v55 }
 0x612   : > { %v2167_v28 = vsel %vm1194_vm5, %v2163_v6, %v2136_v0 }
 0x614   : > { %v2142_v4 = vpop.permute.xlu1 %2141 }
 0x615   : > { %v2140_v5 = vpop.permute.xlu0 %2139  ;;  %v2170_v63 = vsel %vm1194_vm5, %v2166_v14, %v2142_v4 }
 0x616   : > { %v2169_v32 = vsel %vm1194_vm5, %v2165_v8, %v2140_v5 }
 0x61c   : > { %v2154_v60 = vpop.permute.xlu1 %2153 }
 0x61d   : > { %v2152_v9 = vpop.permute.xlu0 %2151  ;;  %v2173_v12 = vsel %vm2171_vm6, %v2168_v10, %v2154_v60 }
 0x61e   : > { %v2172_v11 = vsel %vm2171_vm6, %v2167_v28, %v2152_v9 }
 0x61f   : > { %2750 = vmatprep.mubr.msk.f32.mxu0 %vm352_vm0, %v2172_v11 }
 0x620   : > { %2751 = vmatmul.mubr.msk.f32.vlgmr.msra.gmra.mrb[14].mxu0 %vm352_vm0, %v2173_v12 }
 0x64a   : > { %v2158_v17 = vpop.permute.xlu1 %2157 }
 0x64b   : > { %v2156_v15 = vpop.permute.xlu0 %2155  ;;  %v2175_v31 = vsel %vm2171_vm6, %v2170_v63, %v2158_v17 }
 0x64c   : > { %v2174_v25 = vsel %vm2171_vm6, %v2169_v32, %v2156_v15 }
 0x64d   : > { %2753 = vmatprep.mubr.msk.f32.mxu0 %vm352_vm0, %v2174_v25 }
 0x64e   : > { %2754 = vmatmul.mubr.msk.f32.gmra.mrb[16].mxu0 %vm352_vm0, %v2175_v31 }
 0x6f3   : > { %v2752_v20 = vpop.f32.mrb[14].mxu0 }
 0x6f4   : > { %v2271_v23 = vadd.f32 %v2752_v20, %v2523_v13  ;;  %v2265_v19 = vpop.f32.mrb[15].mxu0 }
 0x6f5   : > { %v2266_v16 = vadd.f32 %v2523_v13, %v2265_v19 }
 0x6f6   : > { %2288 = vst.msk [vmem:[%s340_s15 + $0x10] sm:$0xf] %vm2284_vm7, %v2271_v23 }
 0x6f7   : > { %2289 = vst.msk [vmem:[%s340_s15 + $0x14] sm:$0xf0] %vm2286_vm8, %v2271_v23  ;;  %2287 = vst.msk [vmem:[%s340_s15 + $0x4] sm:$0xf0] %vm2286_vm8, %v2266_v16 }
 0x6f8   : > { %2285 = vst.msk [vmem:[%s340_s15] sm:$0xf] %vm2284_vm7, %v2266_v16 }
 0x721   : > { %v2755_v1 = vpop.f32.mrb[16].mxu0 }
 0x722   : > { %v2281_v22 = vadd.f32 %v2755_v1, %v2523_v13  ;;  %v2275_v24 = vpop.f32.mrb[17].mxu0 }
 0x723   : > { %v2276_v26 = vadd.f32 %v2523_v13, %v2275_v24 }
 0x724   : > { %2292 = vst.msk [vmem:[%s340_s15 + $0x14] sm:$0xf] %vm2284_vm7, %v2281_v22 }
 0x725   : > { %2293 = vst.msk [vmem:[%s340_s15 + $0x18] sm:$0xf0] %vm2286_vm8, %v2281_v22  ;;  %2291 = vst.msk [vmem:[%s340_s15 + $0x8] sm:$0xf0] %vm2286_vm8, %v2276_v26 }
 0x726   : > { %2290 = vst.msk [vmem:[%s340_s15 + $0x4] sm:$0xf] %vm2284_vm7, %v2276_v26 }
 0x727   : > { %3302 = shalt.err (!%p3299_p9)
}
 0x728   : > { %s3303_s6 = scalar_lea.hbm %s4146_s12, 512  ;;  %s3307_s18 = scalar_lea.hbm %s4295_s8, 2048 }
 0x729   : > { %p3304_p7 = scmp.ne.s32.totalorder %s4146_s12, %s3303_s6  ;;  %p3308_p13 = scmp.lt.u32.totalorder %s4146_s12, %s4295_s8 }
 0x72a   : > { %p3309_p0 = scmp.lt.u32.totalorder %s3307_s18, %s3303_s6  ;;  %p3311_p4 = scmp.lt.u32.totalorder %s3303_s6, %s4146_s12 }
 0x72b   : > { %p3305_p5 = pnand %p3304_p7, %p4296_p10 }
 0x72c   : > { %p3310_p12 = por %p3309_p0, %p3308_p13 }
 0x72d   : > { %p3306_p8 = pneg %p3305_p5 }
 0x72e   : > { %p3312_p2 = por %p3311_p4, %p3310_p12 }
 0x730   : > { %p3313_p1 = pnand %p3312_p2, %p3306_p8 }
 0x732   : > { %3316 = shalt.err (!%p3313_p1)
}
 0x733   : > { %s3441_s22 = smov 128  }
 0x734   : > { %2868 = dma.vmem_to_hbm [thread:$0]  (%p4296_p10), %s4148_s29, 512, %s4146_s12, %s4156_s13, %s3441_s22, %s3441_s22, %s3437_s11  }
 0x735 PF: > { %s4297_s17 = sld [smem:[#allocation18_spill]]  ;;  %s4298_s21 = sld [smem:[#allocation24_spill]] }
 0x736   : > { %p2898_p6 = scmp.ge.s32.totalorder %s3423_s28, 2 }
 0x73b   : > { %s2325_s16 = sand.u32 1, %s4297_s17   ;;  %p4299_p11 = scmp.ne.s32.totalorder %s4298_s21, 0 }
 0x73c   : > { %s2326_s10 = scalar_lea.sflag [#allocation5], %s2325_s16 }
 0x73d   : > { %p2888_p3 = pnand %p2898_p6, %p4299_p11 }
 0x73f   : > { %3378 = dma.done.wait (!%p2888_p3), %s2326_s10, 512  }
 0x740   : > { %3380 = vsyncadd (!%p2888_p3), %s2326_s10, 4294966784  ;;  %s23_s28 = sadd.s32 1, %s3423_s28   ;;  %s4300_s21 = sld [smem:[#allocation19_spill]] }
 0x741   : > { %p20_p9 = scmp.ge.s32.totalorder %s23_s28, 6   ;;  %s4301_s11 = sld [smem:[#allocation25_spill]] }
 0x742   : > { %s4302_s14 = sld [smem:[#allocation27_spill]]  ;;  %s4303_s18 = smov %s3387_s19 }
 0x743   : > { %s4304_s19 = smov %s3391_s20  ;;  %s4305_s20 = smov %s3724_s30 }
 0x744   : > { %s4306_s22 = smov %s3403_s23  ;;  %s4307_s23 = smov %s3627_s5 }
 0x745   : > { %s4308_s24 = smov %s3415_s26  ;;  %s4309_s25 = smov %s3419_s27 }
 0x746   :  { %22 = sbr.rel (!%p20_p9) target bundleno = 14 (0xe), region = 109 }
 0x747   : > { %s4310_s26 = smov %s4301_s11 }
 0x748   : > { %s4311_s27 = smov %s4302_s14 }
 0x74d   :  { %2331 = vsyncpa [#allocation4], 1 }
 0x74e   :  { %2333 = vsyncpa [#allocation4 + $0x1], 1 }
 0x74f   :  { %2334 = vsyncpa [#allocation7], 1 }
 0x750   :  { %2335 = vsyncpa [#allocation10], 1 }
 0x751   :  { %2336 = vsyncpa [#allocation5], 1 }
 0x752   :  { %2338 = vsyncpa [#allocation5 + $0x1], 1 }

</bundles_post_ra>
